<compile_context>
chip_gen: v7x
topology: tpu7x:2x2x1
jax: 0.10.0
libtpu: 0.0.40
codegen_flags: <defaults>
</compile_context>

<pallas_src>
import functools

import jax
import jax.numpy as jnp
from jax.experimental import pallas as pl
from jax.experimental.pallas import tpu as pltpu


# ----------------------------------------------------------------------------
# Pallas kernel: whole forward pass.
# ----------------------------------------------------------------------------
def alignment_kernel(src_ref, tgt_ref,
                     w1_ref, w2_ref, w3_ref, fc1_ref, fc2_ref, head_ref,
                     bcol_ref, brow_ref,
                     out_ref,
                     acc_ref,
                     *, n_total, tn):
    """Grid: (batch ["parallel"], point chunks ["arbitrary"])."""
    n_id = pl.program_id(1)

    @pl.when(n_id == 0)
    def _init():
        acc_ref[...] = jnp.full(acc_ref.shape, -jnp.inf, acc_ref.dtype)

    # ---- fused per-point MLP on a (.., tn) chunk, points on lanes ----------
    # Layer 1 (K=3): f32 VPU broadcast-FMAs; src -> sublanes 0..63,
    # tgt -> sublanes 64..127 (block-diagonal fusion of the two PointNets).
    def layer1(x_ref, col0, b_lo, b_hi):
        x0 = x_ref[0, 0:1, :]                                   # (1, tn)
        x1 = x_ref[0, 1:2, :]
        x2 = x_ref[0, 2:3, :]
        return jnp.maximum(x0 * w1_ref[:, col0:col0 + 1]
                           + x1 * w1_ref[:, col0 + 1:col0 + 2]
                           + x2 * w1_ref[:, col0 + 2:col0 + 3]
                           + bcol_ref[b_lo:b_hi, 0:1], 0.0)     # (64, tn)

    h = jnp.concatenate([layer1(src_ref, 0, 0, 64),
                         layer1(tgt_ref, 3, 64, 128)], axis=0)  # (128, tn) f32

    # Layers 2 / 3: bf16 MXU matmuls (block-diagonal weights), f32 accumulate.
    h = jnp.maximum(
        jnp.dot(w2_ref[...], h.astype(jnp.bfloat16),
                preferred_element_type=jnp.float32)
        + bcol_ref[0:128, 1:2], 0.0)                            # (128, tn)
    h = jnp.maximum(
        jnp.dot(w3_ref[...], h.astype(jnp.bfloat16),
                preferred_element_type=jnp.float32)
        + bcol_ref[:, 2:3], 0.0)                                # (256, tn)

    if n_total % tn:  # trace-time: mask the ragged tail chunk before the max
        pos = n_id * tn + jax.lax.broadcasted_iota(jnp.int32, (1, tn), 1)
        h = jnp.where(pos < n_total, h, -jnp.inf)

    # Running max over points: rows 0..127 = src features, 128..255 = tgt.
    acc_ref[...] = jnp.maximum(acc_ref[...],
                               jnp.max(h, axis=1, keepdims=True))

    # ---- FC head, once per batch element ------------------------------------
    @pl.when(n_id == pl.num_programs(1) - 1)
    def _finish():
        feat = acc_ref[...].reshape(1, 256)                     # [fs | ft]
        x = jnp.maximum(
            jnp.dot(feat.astype(jnp.bfloat16), fc1_ref[...],
                    preferred_element_type=jnp.float32)
            + brow_ref[0:1, :], 0.0)                            # (1, 128)
        x = jnp.maximum(
            jnp.dot(x.astype(jnp.bfloat16), fc2_ref[...],
                    preferred_element_type=jnp.float32)
            + brow_ref[1:2, 0:64], 0.0)                         # (1, 64)
        # Fused heads: one zero-padded (64,128) matmul; exp only on lanes 6..8.
        z = (jnp.dot(x.astype(jnp.bfloat16), head_ref[...],
                     preferred_element_type=jnp.float32)
             + brow_ref[2:3, :])                                # (1, 128)
        lane = jax.lax.broadcasted_iota(jnp.int32, z.shape, 1)
        res = jnp.where((lane >= 6) & (lane < 9), jnp.exp(z), z)
        out_ref[...] = res.astype(out_ref.dtype).reshape(1, 1, 128)


# ----------------------------------------------------------------------------
# Parameter packing: 22 tensors -> 8 buffers (MXU weights pre-cast to bf16).
# ----------------------------------------------------------------------------
def pack_params(params):
    (p1w1, p1b1, p1w2, p1b2, p1w3, p1b3,
     p2w1, p2b1, p2w2, p2b2, p2w3, p2b3,
     fc1w, fc1b, fc2w, fc2b,
     tr_w, tr_b, ro_w, ro_b, sc_w, sc_b) = params
    bf16 = jnp.bfloat16
    # Layer-1 weight columns, f32 (VPU): cols 0..2 = src, cols 3..5 = tgt.
    w1c = jnp.concatenate([p1w1.T, p2w1.T], axis=1)                  # (64, 6)
    # Block-diagonal layer-2/3 weights in (out, in) layout, bf16 for the MXU.
    z64 = jnp.zeros((64, 64), jnp.float32)
    w2bd = jnp.block([[p1w2.T, z64], [z64, p2w2.T]]).astype(bf16)    # (128,128)
    z128 = jnp.zeros((128, 64), jnp.float32)
    w3bd = jnp.block([[p1w3.T, z128], [z128, p2w3.T]]).astype(bf16)  # (256,128)
    fc1 = fc1w.astype(bf16)                                          # (256,128)
    fc2 = fc2w.astype(bf16)                                          # (128, 64)
    headw = jnp.pad(jnp.concatenate([tr_w, ro_w, sc_w], axis=1),
                    ((0, 0), (0, 119))).astype(bf16)                 # (64, 128)
    # Column biases for the PointNet part, f32: cols [b1, b2, b3].
    b1c = jnp.pad(jnp.concatenate([p1b1[0], p2b1[0]]), (0, 128))     # (256,)
    b2c = jnp.pad(jnp.concatenate([p1b2[0], p2b2[0]]), (0, 128))     # (256,)
    b3c = jnp.concatenate([p1b3[0], p2b3[0]])                        # (256,)
    bcol = jnp.stack([b1c, b2c, b3c], axis=1)                        # (256, 3)
    # Row biases for the FC head, f32: rows [fc1b, fc2b|pad, head_b|pad].
    headb = jnp.concatenate([tr_b[0], ro_b[0], sc_b[0]])             # (9,)
    brow = jnp.stack([fc1b[0],
                      jnp.pad(fc2b[0], (0, 64)),
                      jnp.pad(headb, (0, 119))], axis=0)             # (3, 128)
    return (w1c, w2bd, w3bd, fc1, fc2, headw, bcol, brow)


# ----------------------------------------------------------------------------
# Wrapper
# ----------------------------------------------------------------------------
_TN_CAP = 2048  # points per chunk (multiple of 128); bounds VMEM per grid step


def alignment_forward(source, target, params):
    """source/target: (B, 3, N) float32, PyTorch NCL layout."""
    B, C, N = source.shape
    assert C == 3 and target.shape == (B, C, N)
    packed = pack_params(params)

    tn = N if N <= _TN_CAP else _TN_CAP
    grid = (B, pl.cdiv(N, tn))

    def _full_spec(arr):
        nd = arr.ndim
        return pl.BlockSpec(arr.shape, lambda b, n, _nd=nd: (0,) * _nd)

    pts_spec = pl.BlockSpec((1, 3, tn), lambda b, n: (b, 0, n))

    kernel = functools.partial(alignment_kernel, n_total=N, tn=tn)

    out_padded = pl.pallas_call(
        kernel,
        out_shape=jax.ShapeDtypeStruct((B, 1, 128), jnp.float32),
        grid_spec=pltpu.PrefetchScalarGridSpec(
            num_scalar_prefetch=0,
            grid=grid,
            in_specs=[pts_spec, pts_spec] + [_full_spec(p) for p in packed],
            out_specs=pl.BlockSpec((1, 1, 128), lambda b, n: (b, 0, 0)),
            scratch_shapes=[pltpu.VMEM((256, 1), jnp.float32)],
        ),
        compiler_params=pltpu.CompilerParams(
            dimension_semantics=("parallel", "arbitrary"),
            vmem_limit_bytes=32 * 1024 * 1024),
    )(source, target, *packed)

    return out_padded[:, 0, :9]


# ----------------------------------------------------------------------------
# Deterministic parameter construction (PyTorch-style shapes, BN folded)
# ----------------------------------------------------------------------------
def _linear_params(key, c_in, c_out):
    k1, k2 = jax.random.split(key)
    bound = 1.0 / jnp.sqrt(c_in)
    w = jax.random.uniform(k1, (c_in, c_out), jnp.float32, -bound, bound)
    b = jax.random.uniform(k2, (1, c_out), jnp.float32, -bound, bound)
    return w, b


def _pointnet_params(key, c_in, c_out, eps=1e-5):
    """Conv1d(k=1)+BatchNorm1d (eval) folded into (w, b) pairs, (in,out) layout."""
    dims = [(c_in, 64), (64, 64), (64, c_out)]
    params = []
    for ci, co in dims:
        key, kw, kb, kg, kbeta = jax.random.split(key, 5)
        bound = 1.0 / jnp.sqrt(ci)
        w = jax.random.uniform(kw, (ci, co), jnp.float32, -bound, bound)
        b = jax.random.uniform(kb, (1, co), jnp.float32, -bound, bound)
        gamma = 1.0 + 0.1 * jax.random.normal(kg, (co,), jnp.float32)
        beta = 0.1 * jax.random.normal(kbeta, (co,), jnp.float32)
        running_mean = jnp.zeros((co,), jnp.float32)
        running_var = jnp.ones((co,), jnp.float32)
        scale = gamma / jnp.sqrt(running_var + eps)
        w_f = w * scale[None, :]
        b_f = ((b[0] - running_mean) * scale + beta)[None, :]
        params += [w_f, b_f]
    return key, params


def build_params(key):
    key, pn1 = _pointnet_params(key, 3, 128)
    key, pn2 = _pointnet_params(key, 3, 128)
    key, k1, k2, k3, k4, k5 = jax.random.split(key, 6)
    fc1w, fc1b = _linear_params(k1, 256, 128)
    fc2w, fc2b = _linear_params(k2, 128, 64)
    tr_w, tr_b = _linear_params(k3, 64, 3)
    ro_w, ro_b = _linear_params(k4, 64, 3)
    sc_w, sc_b = _linear_params(k5, 64, 3)
    return pn1 + pn2 + [fc1w, fc1b, fc2w, fc2b,
                        tr_w, tr_b, ro_w, ro_b, sc_w, sc_b]


# ----------------------------------------------------------------------------
# Pure-JAX f32 reference (same math) for a correctness check
# ----------------------------------------------------------------------------
def reference(source, target, params):
    (p1w1, p1b1, p1w2, p1b2, p1w3, p1b3,
     p2w1, p2b1, p2w2, p2b2, p2w3, p2b3,
     fc1w, fc1b, fc2w, fc2b,
     tr_w, tr_b, ro_w, ro_b, sc_w, sc_b) = params

    def pointnet(x_ncl, w1, b1, w2, b2, w3, b3):
        x = jnp.transpose(x_ncl, (0, 2, 1))                     # (B, N, 3)
        h = jnp.maximum(jnp.einsum("bnc,cd->bnd", x, w1) + b1, 0.0)
        h = jnp.maximum(jnp.einsum("bnc,cd->bnd", h, w2) + b2, 0.0)
        h = jnp.maximum(jnp.einsum("bnc,cd->bnd", h, w3) + b3, 0.0)
        return jnp.max(h, axis=1)                               # (B, 128)

    fs = pointnet(source, p1w1, p1b1, p1w2, p1b2, p1w3, p1b3)
    ft = pointnet(target, p2w1, p2b1, p2w2, p2b2, p2w3, p2b3)
    x = jnp.concatenate([fs, ft], axis=1)
    x = jnp.maximum(x @ fc1w + fc1b, 0.0)
    x = jnp.maximum(x @ fc2w + fc2b, 0.0)
    t = x @ tr_w + tr_b
    r = x @ ro_w + ro_b
    s = jnp.exp(x @ sc_w + sc_b)
    return jnp.concatenate([t, r, s], axis=1)


# ----------------------------------------------------------------------------
if __name__ == "__main__":
    key = jax.random.PRNGKey(0)
    key, ks, kt = jax.random.split(key, 3)

    B, N = 2, 16  # batch, number of points per cloud
    # PyTorch NCL layout: (B, 3, N) — consumed directly by the kernel.
    source = jax.random.normal(ks, (B, 3, N), jnp.float32)
    target = jax.random.normal(kt, (B, 3, N), jnp.float32)

    params = build_params(key)

    out = alignment_forward(source, target, params)
    out = jax.block_until_ready(out)

    ref = reference(source, target, params)
    assert out.shape == (B, 9), out.shape
    # bf16 MXU operands -> compare against the f32 reference with a loose tol.
    assert jnp.allclose(out, ref, atol=5e-2, rtol=5e-2), (out, ref)

    print("KERNEL_OK")
</pallas_src>

<mosaic_0001>
module attributes {stable_mosaic.version = 11 : i64} {
  func.func @alignment_kernel(%arg0: i32, %arg1: i32, %arg2: memref<1x3x16xf32, #tpu.memory_space<vmem>>, %arg3: memref<1x3x16xf32, #tpu.memory_space<vmem>>, %arg4: memref<64x6xf32, #tpu.memory_space<vmem>>, %arg5: memref<128x128xbf16, #tpu.memory_space<vmem>>, %arg6: memref<256x128xbf16, #tpu.memory_space<vmem>>, %arg7: memref<256x128xbf16, #tpu.memory_space<vmem>>, %arg8: memref<128x64xbf16, #tpu.memory_space<vmem>>, %arg9: memref<64x128xbf16, #tpu.memory_space<vmem>>, %arg10: memref<256x3xf32, #tpu.memory_space<vmem>>, %arg11: memref<3x128xf32, #tpu.memory_space<vmem>>, %arg12: memref<1x1x128xf32, #tpu.memory_space<vmem>>, %arg13: memref<256x1xf32, #tpu.memory_space<vmem>>) attributes {dimension_semantics = [#tpu.dimension_semantics<parallel>, #tpu.dimension_semantics<arbitrary>], iteration_bounds = array<i64: 2, 1>, scalar_prefetch = 0 : i64, scratch_operands = 1 : i64, tpu.core_type = #tpu.core_type<tc>, window_params = [{transform_indices = @transform_0, window_bounds = array<i64: 1, 3, 16>}, {transform_indices = @transform_1, window_bounds = array<i64: 1, 3, 16>}, {pipeline_mode = #tpu.pipeline_mode<synchronous>, transform_indices = @transform_2, window_bounds = array<i64: 64, 6>}, {pipeline_mode = #tpu.pipeline_mode<synchronous>, transform_indices = @transform_3, window_bounds = array<i64: 128, 128>}, {pipeline_mode = #tpu.pipeline_mode<synchronous>, transform_indices = @transform_4, window_bounds = array<i64: 256, 128>}, {pipeline_mode = #tpu.pipeline_mode<synchronous>, transform_indices = @transform_5, window_bounds = array<i64: 256, 128>}, {pipeline_mode = #tpu.pipeline_mode<synchronous>, transform_indices = @transform_6, window_bounds = array<i64: 128, 64>}, {pipeline_mode = #tpu.pipeline_mode<synchronous>, transform_indices = @transform_7, window_bounds = array<i64: 64, 128>}, {pipeline_mode = #tpu.pipeline_mode<synchronous>, transform_indices = @transform_8, window_bounds = array<i64: 256, 3>}, {pipeline_mode = #tpu.pipeline_mode<synchronous>, transform_indices = @transform_9, window_bounds = array<i64: 3, 128>}, {transform_indices = @transform_10, window_bounds = array<i64: 1, 1, 128>}]} {
    %c0_i32 = arith.constant 0 : i32
    %0 = arith.cmpi eq, %arg1, %c0_i32 : i32
    %1 = arith.extui %0 : i1 to i32
    %c0_i32_0 = arith.constant 0 : i32
    %2 = arith.cmpi ne, %1, %c0_i32_0 : i32
    scf.if %2 {
      %cst_48 = arith.constant 0xFF800000 : f32
      %78 = vector.broadcast %cst_48 : f32 to vector<256x1xf32>
      %c0_49 = arith.constant 0 : index
      %c0_50 = arith.constant 0 : index
      %79 = vector.load %arg13[%c0_49, %c0_50] : memref<256x1xf32, #tpu.memory_space<vmem>>, vector<256x1xf32>
      tpu.vector_store %arg13[%c0_49, %c0_50], %78 {strides = array<i32>} : memref<256x1xf32, #tpu.memory_space<vmem>>, vector<256x1xf32>,
    } else {
    }
    %c0 = arith.constant 0 : index
    %c0_1 = arith.constant 0 : index
    %c0_2 = arith.constant 0 : index
    %3 = vector.load %arg2[%c0, %c0_1, %c0_2] : memref<1x3x16xf32, #tpu.memory_space<vmem>>, vector<1x1x16xf32>
    %4 = vector.shape_cast %3 : vector<1x1x16xf32> to vector<1x16xf32>
    %c0_3 = arith.constant 0 : index
    %c1 = arith.constant 1 : index
    %c0_4 = arith.constant 0 : index
    %5 = vector.load %arg2[%c0_3, %c1, %c0_4] : memref<1x3x16xf32, #tpu.memory_space<vmem>>, vector<1x1x16xf32>
    %6 = vector.shape_cast %5 : vector<1x1x16xf32> to vector<1x16xf32>
    %c0_5 = arith.constant 0 : index
    %c2 = arith.constant 2 : index
    %c0_6 = arith.constant 0 : index
    %7 = vector.load %arg2[%c0_5, %c2, %c0_6] : memref<1x3x16xf32, #tpu.memory_space<vmem>>, vector<1x1x16xf32>
    %8 = vector.shape_cast %7 : vector<1x1x16xf32> to vector<1x16xf32>
    %c0_7 = arith.constant 0 : index
    %c0_8 = arith.constant 0 : index
    %9 = vector.load %arg4[%c0_7, %c0_8] : memref<64x6xf32, #tpu.memory_space<vmem>>, vector<64x1xf32>
    %10 = vector.broadcast %4 : vector<1x16xf32> to vector<64x16xf32>
    %11 = vector.broadcast %9 : vector<64x1xf32> to vector<64x16xf32>
    %12 = arith.mulf %10, %11 : vector<64x16xf32>
    %c0_9 = arith.constant 0 : index
    %c1_10 = arith.constant 1 : index
    %13 = vector.load %arg4[%c0_9, %c1_10] : memref<64x6xf32, #tpu.memory_space<vmem>>, vector<64x1xf32>
    %14 = vector.broadcast %6 : vector<1x16xf32> to vector<64x16xf32>
    %15 = vector.broadcast %13 : vector<64x1xf32> to vector<64x16xf32>
    %16 = arith.mulf %14, %15 : vector<64x16xf32>
    %17 = arith.addf %12, %16 : vector<64x16xf32>
    %c0_11 = arith.constant 0 : index
    %c2_12 = arith.constant 2 : index
    %18 = vector.load %arg4[%c0_11, %c2_12] : memref<64x6xf32, #tpu.memory_space<vmem>>, vector<64x1xf32>
    %19 = vector.broadcast %8 : vector<1x16xf32> to vector<64x16xf32>
    %20 = vector.broadcast %18 : vector<64x1xf32> to vector<64x16xf32>
    %21 = arith.mulf %19, %20 : vector<64x16xf32>
    %22 = arith.addf %17, %21 : vector<64x16xf32>
    %c0_13 = arith.constant 0 : index
    %c0_14 = arith.constant 0 : index
    %23 = vector.load %arg10[%c0_13, %c0_14] : memref<256x3xf32, #tpu.memory_space<vmem>>, vector<64x1xf32>
    %24 = vector.broadcast %23 : vector<64x1xf32> to vector<64x16xf32>
    %25 = arith.addf %22, %24 : vector<64x16xf32>
    %cst = arith.constant 0.000000e+00 : f32
    %26 = vector.broadcast %cst : f32 to vector<64x16xf32>
    %27 = arith.maximumf %25, %26 : vector<64x16xf32>
    %c0_15 = arith.constant 0 : index
    %c0_16 = arith.constant 0 : index
    %c0_17 = arith.constant 0 : index
    %28 = vector.load %arg3[%c0_15, %c0_16, %c0_17] : memref<1x3x16xf32, #tpu.memory_space<vmem>>, vector<1x1x16xf32>
    %29 = vector.shape_cast %28 : vector<1x1x16xf32> to vector<1x16xf32>
    %c0_18 = arith.constant 0 : index
    %c1_19 = arith.constant 1 : index
    %c0_20 = arith.constant 0 : index
    %30 = vector.load %arg3[%c0_18, %c1_19, %c0_20] : memref<1x3x16xf32, #tpu.memory_space<vmem>>, vector<1x1x16xf32>
    %31 = vector.shape_cast %30 : vector<1x1x16xf32> to vector<1x16xf32>
    %c0_21 = arith.constant 0 : index
    %c2_22 = arith.constant 2 : index
    %c0_23 = arith.constant 0 : index
    %32 = vector.load %arg3[%c0_21, %c2_22, %c0_23] : memref<1x3x16xf32, #tpu.memory_space<vmem>>, vector<1x1x16xf32>
    %33 = vector.shape_cast %32 : vector<1x1x16xf32> to vector<1x16xf32>
    %c0_24 = arith.constant 0 : index
    %c3 = arith.constant 3 : index
    %34 = vector.load %arg4[%c0_24, %c3] : memref<64x6xf32, #tpu.memory_space<vmem>>, vector<64x1xf32>
    %35 = vector.broadcast %29 : vector<1x16xf32> to vector<64x16xf32>
    %36 = vector.broadcast %34 : vector<64x1xf32> to vector<64x16xf32>
    %37 = arith.mulf %35, %36 : vector<64x16xf32>
    %c0_25 = arith.constant 0 : index
    %c4 = arith.constant 4 : index
    %38 = vector.load %arg4[%c0_25, %c4] : memref<64x6xf32, #tpu.memory_space<vmem>>, vector<64x1xf32>
    %39 = vector.broadcast %31 : vector<1x16xf32> to vector<64x16xf32>
    %40 = vector.broadcast %38 : vector<64x1xf32> to vector<64x16xf32>
    %41 = arith.mulf %39, %40 : vector<64x16xf32>
    %42 = arith.addf %37, %41 : vector<64x16xf32>
    %c0_26 = arith.constant 0 : index
    %c5 = arith.constant 5 : index
    %43 = vector.load %arg4[%c0_26, %c5] : memref<64x6xf32, #tpu.memory_space<vmem>>, vector<64x1xf32>
    %44 = vector.broadcast %33 : vector<1x16xf32> to vector<64x16xf32>
    %45 = vector.broadcast %43 : vector<64x1xf32> to vector<64x16xf32>
    %46 = arith.mulf %44, %45 : vector<64x16xf32>
    %47 = arith.addf %42, %46 : vector<64x16xf32>
    %c64 = arith.constant 64 : index
    %c0_27 = arith.constant 0 : index
    %48 = vector.load %arg10[%c64, %c0_27] : memref<256x3xf32, #tpu.memory_space<vmem>>, vector<64x1xf32>
    %49 = vector.broadcast %48 : vector<64x1xf32> to vector<64x16xf32>
    %50 = arith.addf %47, %49 : vector<64x16xf32>
    %cst_28 = arith.constant 0.000000e+00 : f32
    %51 = vector.broadcast %cst_28 : f32 to vector<64x16xf32>
    %52 = arith.maximumf %50, %51 : vector<64x16xf32>
    %53 = tpu.concatenate %27, %52 in 0 : vector<64x16xf32>, vector<64x16xf32> -> vector<128x16xf32>
    %c0_29 = arith.constant 0 : index
    %c0_30 = arith.constant 0 : index
    %54 = vector.load %arg5[%c0_29, %c0_30] : memref<128x128xbf16, #tpu.memory_space<vmem>>, vector<128x128xbf16>
    %55 = arith.truncf %53 : vector<128x16xf32> to vector<128x16xbf16>
    %cst_31 = arith.constant dense<0.000000e+00> : vector<128x16xf32>
    %56 = tpu.matmul %54, %55, %cst_31 {dimension_numbers = #tpu.dot_dimension_numbers<[1], [0], [0], [1], [0, 0, 1, 1], [], []>} : vector<128x128xbf16>, vector<128x16xbf16>, vector<128x16xf32> -> vector<128x16xf32>
    %c0_32 = arith.constant 0 : index
    %c1_33 = arith.constant 1 : index
    %57 = vector.load %arg10[%c0_32, %c1_33] : memref<256x3xf32, #tpu.memory_space<vmem>>, vector<128x1xf32>
    %58 = vector.broadcast %57 : vector<128x1xf32> to vector<128x16xf32>
    %59 = arith.addf %56, %58 : vector<128x16xf32>
    %cst_34 = arith.constant 0.000000e+00 : f32
    %60 = vector.broadcast %cst_34 : f32 to vector<128x16xf32>
    %61 = arith.maximumf %59, %60 : vector<128x16xf32>
    %c0_35 = arith.constant 0 : index
    %c0_36 = arith.constant 0 : index
    %62 = vector.load %arg6[%c0_35, %c0_36] : memref<256x128xbf16, #tpu.memory_space<vmem>>, vector<256x128xbf16>
    %63 = arith.truncf %61 : vector<128x16xf32> to vector<128x16xbf16>
    %cst_37 = arith.constant dense<0.000000e+00> : vector<256x16xf32>
    %64 = tpu.matmul %62, %63, %cst_37 {dimension_numbers = #tpu.dot_dimension_numbers<[1], [0], [0], [1], [0, 0, 1, 1], [], []>} : vector<256x128xbf16>, vector<128x16xbf16>, vector<256x16xf32> -> vector<256x16xf32>
    %c0_38 = arith.constant 0 : index
    %c2_39 = arith.constant 2 : index
    %65 = vector.load %arg10[%c0_38, %c2_39] : memref<256x3xf32, #tpu.memory_space<vmem>>, vector<256x1xf32>
    %66 = vector.broadcast %65 : vector<256x1xf32> to vector<256x16xf32>
    %67 = arith.addf %64, %66 : vector<256x16xf32>
    %cst_40 = arith.constant 0.000000e+00 : f32
    %68 = vector.broadcast %cst_40 : f32 to vector<256x16xf32>
    %69 = arith.maximumf %67, %68 : vector<256x16xf32>
    %c0_41 = arith.constant 0 : index
    %c0_42 = arith.constant 0 : index
    %70 = vector.load %arg13[%c0_41, %c0_42] : memref<256x1xf32, #tpu.memory_space<vmem>>, vector<256x1xf32>
    %cst_43 = arith.constant dense<0xFF800000> : vector<256xf32>
    %71 = vector.multi_reduction <maximumf>, %69, %cst_43 [1] : vector<256x16xf32> to vector<256xf32>
    %72 = vector.shape_cast %71 : vector<256xf32> to vector<256x1xf32>
    %73 = arith.maximumf %70, %72 : vector<256x1xf32>
    %c0_44 = arith.constant 0 : index
    %c0_45 = arith.constant 0 : index
    %74 = vector.load %arg13[%c0_44, %c0_45] : memref<256x1xf32, #tpu.memory_space<vmem>>, vector<256x1xf32>
    tpu.vector_store %arg13[%c0_44, %c0_45], %73 {strides = array<i32>} : memref<256x1xf32, #tpu.memory_space<vmem>>, vector<256x1xf32>,
    %c0_i32_46 = arith.constant 0 : i32
    %75 = arith.cmpi eq, %arg1, %c0_i32_46 : i32
    %76 = arith.extui %75 : i1 to i32
    %c0_i32_47 = arith.constant 0 : i32
    %77 = arith.cmpi ne, %76, %c0_i32_47 : i32
    scf.if %77 {
      %c0_48 = arith.constant 0 : index
      %c0_49 = arith.constant 0 : index
      %78 = vector.load %arg13[%c0_48, %c0_49] : memref<256x1xf32, #tpu.memory_space<vmem>>, vector<256x1xf32>
      %79 = vector.shape_cast %78 : vector<256x1xf32> to vector<1x256xf32>
      %80 = arith.truncf %79 : vector<1x256xf32> to vector<1x256xbf16>
      %c0_50 = arith.constant 0 : index
      %c0_51 = arith.constant 0 : index
      %81 = vector.load %arg7[%c0_50, %c0_51] : memref<256x128xbf16, #tpu.memory_space<vmem>>, vector<256x128xbf16>
      %cst_52 = arith.constant dense<0.000000e+00> : vector<1x128xf32>
      %82 = tpu.matmul %80, %81, %cst_52 {dimension_numbers = #tpu.dot_dimension_numbers<[1], [0], [0], [1], [0, 0, 1, 1], [], []>} : vector<1x256xbf16>, vector<256x128xbf16>, vector<1x128xf32> -> vector<1x128xf32>
      %c0_53 = arith.constant 0 : index
      %c0_54 = arith.constant 0 : index
      %83 = vector.load %arg11[%c0_53, %c0_54] : memref<3x128xf32, #tpu.memory_space<vmem>>, vector<1x128xf32>
      %84 = arith.addf %82, %83 : vector<1x128xf32>
      %cst_55 = arith.constant 0.000000e+00 : f32
      %85 = vector.broadcast %cst_55 : f32 to vector<1x128xf32>
      %86 = arith.maximumf %84, %85 : vector<1x128xf32>
      %87 = arith.truncf %86 : vector<1x128xf32> to vector<1x128xbf16>
      %c0_56 = arith.constant 0 : index
      %c0_57 = arith.constant 0 : index
      %88 = vector.load %arg8[%c0_56, %c0_57] : memref<128x64xbf16, #tpu.memory_space<vmem>>, vector<128x64xbf16>
      %cst_58 = arith.constant dense<0.000000e+00> : vector<1x64xf32>
      %89 = tpu.matmul %87, %88, %cst_58 {dimension_numbers = #tpu.dot_dimension_numbers<[1], [0], [0], [1], [0, 0, 1, 1], [], []>} : vector<1x128xbf16>, vector<128x64xbf16>, vector<1x64xf32> -> vector<1x64xf32>
      %c1_59 = arith.constant 1 : index
      %c0_60 = arith.constant 0 : index
      %90 = vector.load %arg11[%c1_59, %c0_60] : memref<3x128xf32, #tpu.memory_space<vmem>>, vector<1x64xf32>
      %91 = arith.addf %89, %90 : vector<1x64xf32>
      %cst_61 = arith.constant 0.000000e+00 : f32
      %92 = vector.broadcast %cst_61 : f32 to vector<1x64xf32>
      %93 = arith.maximumf %91, %92 : vector<1x64xf32>
      %94 = arith.truncf %93 : vector<1x64xf32> to vector<1x64xbf16>
      %c0_62 = arith.constant 0 : index
      %c0_63 = arith.constant 0 : index
      %95 = vector.load %arg9[%c0_62, %c0_63] : memref<64x128xbf16, #tpu.memory_space<vmem>>, vector<64x128xbf16>
      %cst_64 = arith.constant dense<0.000000e+00> : vector<1x128xf32>
      %96 = tpu.matmul %94, %95, %cst_64 {dimension_numbers = #tpu.dot_dimension_numbers<[1], [0], [0], [1], [0, 0, 1, 1], [], []>} : vector<1x64xbf16>, vector<64x128xbf16>, vector<1x128xf32> -> vector<1x128xf32>
      %c2_65 = arith.constant 2 : index
      %c0_66 = arith.constant 0 : index
      %97 = vector.load %arg11[%c2_65, %c0_66] : memref<3x128xf32, #tpu.memory_space<vmem>>, vector<1x128xf32>
      %98 = arith.addf %96, %97 : vector<1x128xf32>
      %99 = tpu.iota {dimensions = array<i32: 1>} : vector<1x128xi32>
      %c6_i32 = arith.constant 6 : i32
      %100 = vector.broadcast %c6_i32 : i32 to vector<1x128xi32>
      %101 = arith.cmpi sge, %99, %100 : vector<1x128xi32>
      %c9_i32 = arith.constant 9 : i32
      %102 = vector.broadcast %c9_i32 : i32 to vector<1x128xi32>
      %103 = arith.cmpi slt, %99, %102 : vector<1x128xi32>
      %104 = arith.andi %101, %103 : vector<1x128xi1>
      %105 = math.exp %98 : vector<1x128xf32>
      %106 = arith.select %104, %105, %98 : vector<1x128xi1>, vector<1x128xf32>
      %107 = vector.shape_cast %106 : vector<1x128xf32> to vector<1x1x128xf32>
      %c0_67 = arith.constant 0 : index
      %c0_68 = arith.constant 0 : index
      %c0_69 = arith.constant 0 : index
      %108 = vector.load %arg12[%c0_67, %c0_68, %c0_69] : memref<1x1x128xf32, #tpu.memory_space<vmem>>, vector<1x1x128xf32>
      tpu.vector_store %arg12[%c0_67, %c0_68, %c0_69], %107 {strides = array<i32>} : memref<1x1x128xf32, #tpu.memory_space<vmem>>, vector<1x1x128xf32>,
    } else {
    }
    return
  }
  func.func @transform_0(%arg0: i32, %arg1: i32) -> (i32, i32, i32) {
    %c0_i32 = arith.constant 0 : i32
    %c0_i32_0 = arith.constant 0 : i32
    return %arg0, %c0_i32, %arg1 : i32, i32, i32
  }
  func.func @transform_1(%arg0: i32, %arg1: i32) -> (i32, i32, i32) {
    %c0_i32 = arith.constant 0 : i32
    %c0_i32_0 = arith.constant 0 : i32
    return %arg0, %c0_i32, %arg1 : i32, i32, i32
  }
  func.func @transform_2(%arg0: i32, %arg1: i32) -> (i32, i32) {
    %c0_i32 = arith.constant 0 : i32
    %c0_i32_0 = arith.constant 0 : i32
    %c0_i32_1 = arith.constant 0 : i32
    return %c0_i32, %c0_i32_0 : i32, i32
  }
  func.func @transform_3(%arg0: i32, %arg1: i32) -> (i32, i32) {
    %c0_i32 = arith.constant 0 : i32
    %c0_i32_0 = arith.constant 0 : i32
    %c0_i32_1 = arith.constant 0 : i32
    return %c0_i32, %c0_i32_0 : i32, i32
  }
  func.func @transform_4(%arg0: i32, %arg1: i32) -> (i32, i32) {
    %c0_i32 = arith.constant 0 : i32
    %c0_i32_0 = arith.constant 0 : i32
    %c0_i32_1 = arith.constant 0 : i32
    return %c0_i32, %c0_i32_0 : i32, i32
  }
  func.func @transform_5(%arg0: i32, %arg1: i32) -> (i32, i32) {
    %c0_i32 = arith.constant 0 : i32
    %c0_i32_0 = arith.constant 0 : i32
    %c0_i32_1 = arith.constant 0 : i32
    return %c0_i32, %c0_i32_0 : i32, i32
  }
  func.func @transform_6(%arg0: i32, %arg1: i32) -> (i32, i32) {
    %c0_i32 = arith.constant 0 : i32
    %c0_i32_0 = arith.constant 0 : i32
    %c0_i32_1 = arith.constant 0 : i32
    return %c0_i32, %c0_i32_0 : i32, i32
  }
  func.func @transform_7(%arg0: i32, %arg1: i32) -> (i32, i32) {
    %c0_i32 = arith.constant 0 : i32
    %c0_i32_0 = arith.constant 0 : i32
    %c0_i32_1 = arith.constant 0 : i32
    return %c0_i32, %c0_i32_0 : i32, i32
  }
  func.func @transform_8(%arg0: i32, %arg1: i32) -> (i32, i32) {
    %c0_i32 = arith.constant 0 : i32
    %c0_i32_0 = arith.constant 0 : i32
    %c0_i32_1 = arith.constant 0 : i32
    return %c0_i32, %c0_i32_0 : i32, i32
  }
  func.func @transform_9(%arg0: i32, %arg1: i32) -> (i32, i32) {
    %c0_i32 = arith.constant 0 : i32
    %c0_i32_0 = arith.constant 0 : i32
    %c0_i32_1 = arith.constant 0 : i32
    return %c0_i32, %c0_i32_0 : i32, i32
  }
  func.func @transform_10(%arg0: i32, %arg1: i32) -> (i32, i32, i32) {
    %c0_i32 = arith.constant 0 : i32
    %c0_i32_0 = arith.constant 0 : i32
    %c0_i32_1 = arith.constant 0 : i32
    return %arg0, %c0_i32, %c0_i32_0 : i32, i32, i32
  }
}

</mosaic_0001>

<bundles_post_ra>
// kernel: tpu_custom_call.1
= control target key start
LH: loop header
LB: loop body
LE: loop exit
PB: predicated region body
PF: predicated region fallthrough
CT: control target
= control target key end

     0   :  { %s4227_s0 = inlined_call_operand.vmem [shape: f32[2,3,16], index: 0, kind: input, shape index: {}]   ;;  %s4228_s1 = inlined_call_operand.vmem [shape: f32[2,3,16], index: 1, kind: input, shape index: {}]   ;;  %s4229_s2 = inlined_call_operand.vmem [shape: f32[64,6], index: 2, kind: input, shape index: {}]   ;;  %s4230_s3 = inlined_call_operand.vmem [shape: bf16[128,128], index: 3, kind: input, shape index: {}]   ;;  %s4231_s4 = inlined_call_operand.vmem [shape: bf16[256,128], index: 4, kind: input, shape index: {}]   ;;  %s4232_s5 = inlined_call_operand.vmem [shape: bf16[256,128], index: 5, kind: input, shape index: {}]   ;;  %s4233_s6 = inlined_call_operand.vmem [shape: bf16[128,64], index: 6, kind: input, shape index: {}]   ;;  %s4234_s7 = inlined_call_operand.vmem [shape: bf16[64,128], index: 7, kind: input, shape index: {}]   ;;  %s4235_s8 = inlined_call_operand.vmem [shape: f32[256,3], index: 8, kind: input, shape index: {}]   ;;  %s4236_s9 = inlined_call_operand.vmem [shape: f32[3,128], index: 9, kind: input, shape index: {}]   ;;  %s4237_s10 = inlined_call_operand.hbm [shape: f32[2,1,128], index: 10, kind: output, shape index: {}]  }
   0x1   :  { %4238 = sst [smem:[#allocation6_spill]] %s4227_s0 }
   0x2   :  { %15 = vsyncpa [#allocation4], 0 }
   0x3   :  { %17 = vsyncpa [#allocation4 + $0x1], 0  ;;  %s3275_s13 = smov 0   ;;  %s3277_s14 = smov 0  }
   0x4   :  { %s3279_s15 = smov 0   ;;  %s3281_s16 = smov 0  }
   0x5   :  { %s3283_s17 = smov 0   ;;  %s3285_s18 = smov 0  }
   0x6 LB: > { %s2714_s19 = sadd.s32 4294967295, %s3208_s18   ;;  %s2715_s20 = sadd.s32 4294967294, %s3208_s18   ;;  %s3208_s18 = sphi %s3285_s18, %s23_s18   ;;  %s3204_s17 = sphi %s3283_s17, %s4246_s17   ;;  %s3200_s16 = sphi %s3281_s16, %s4245_s16   ;;  %s3196_s15 = sphi %s3279_s15, %s4244_s15   ;;  %s3192_s14 = sphi %s3277_s14, %s4243_s14   ;;  %s3188_s13 = sphi %s3275_s13, %s4242_s13  }
   0x7   : > { %s35_s21 = sadd.s32 1, %s3204_s17  ;;  %s266_s22 = sadd.s32 1, %s3196_s15 }
   0x8   : > { %p37_p0 = scmp.ge.s32.totalorder %s35_s21, 2  ;;  %p276_p1 = scmp.ne.s32.totalorder %s3196_s15, %s3192_s14 }
   0x9   : > { %p277_p2 = scmp.eq.s32.totalorder %s2714_s19, 1  ;;  %p282_p3 = scmp.ne.s32.totalorder %s3192_s14, %s3188_s13 }
   0xa   : > { %s4248_s21 = smov (%p37_p0, %s35_s21), 0  ;;  %p283_p5 = scmp.eq.s32.totalorder %s2715_s20, 1 }
   0xb   : > { %p3315_p4 = por %p277_p2, %p276_p1  ;;  %s263_s24 = ssub.s32 %s3204_s17, %s4248_s21 }
   0xc   : > { %p2718_p6 = scmp.ge.s32.totalorder %s3208_s18, 1  ;;  %p264_p7 = scmp.eq.s32.totalorder %s263_s24, 0 }
   0xd   : > { %p3322_p8 = por %p283_p5, %p282_p3  ;;  %p345_p9 = scmp.lt.s32.totalorder %s3208_s18, 3 }
   0xe   : > { %s3328_s26 = scalar_select %p264_p7, %s3196_s15, %s266_s22  }
   0xf   : > { %p346_p10 = pnand %p2718_p6, %p345_p9 }
  0x10   : > { %v3333_v0 = vld [vmem:[%s4229_s2] sm:$0xff] (!%p346_p10)  ;;  %v3210_v1 = vmov (!%p346_p10), 2   ;;  %v3211_v2 = vmov (!%p346_p10), 1   ;;  %v3342_v3 = vld [vmem:[%s4229_s2 + $0x10] sm:$0xff] (!%p346_p10)  ;;  %v3347_v4 = vld [vmem:[%s4229_s2 + $0x8] sm:$0xff] (!%p346_p10)  ;;  %v3212_v7 = vmov (!%p346_p10), 0  }
  0x11   : > { %349 = sbr.rel (%p346_p10) target bundleno = 1870 (0x74e), region = 60  ;;  %3036 = vset.pattern.permute.xlu0 (!%p346_p10), %v3210_v1  ;;  %3035 = vset.pattern.permute.xlu1 (!%p346_p10), %v3211_v2  ;;  %v3354_v5 = vld [vmem:[%s4229_s2 + $0x28] sm:$0xff] (!%p346_p10)  ;;  %v3361_v6 = vld [vmem:[%s4229_s2 + $0x20] sm:$0xff] (!%p346_p10)  ;;  %v3370_v8 = vld [vmem:[%s4229_s2 + $0x38] sm:$0xff] (!%p346_p10)  ;;  %v3213_v15 = vmov (!%p346_p10), 4   ;;  %v3214_v18 = vmov (!%p346_p10), 3  }
  0x12   : > { %563 = vperm.xlu0 (!%p346_p10), %3036, %v3333_v0   ;;  %511 = vperm.xlu1 (!%p346_p10), %3035, %v3333_v0   ;;  %v3378_v9 = vld [vmem:[%s4229_s2 + $0x18] sm:$0xff] (!%p346_p10)  ;;  %v3390_v10 = vld [vmem:[%s4235_s8] sm:$0xff] (!%p346_p10)  ;;  %v3396_v11 = vld [vmem:[%s4235_s8 + $0x8] sm:$0xff] (!%p346_p10)  ;;  %v3215_v19 = vmov (!%p346_p10), 5   ;;  %p391_p11 = scmp.lt.s32.totalorder (!%p346_p10), %s3200_s16, 1  ;;  %s4241_s0 = sld [smem:[#allocation6_spill]] (!%p346_p10) }
  0x13   : > { %v3403_v12 = vld [vmem:[%s4229_s2 + $0x30] sm:$0xff] (!%p346_p10)  ;;  %v3410_v13 = vld [vmem:[%s4235_s8 + $0x20] sm:$0xff] (!%p346_p10)  ;;  %v3438_v17 = vld [vmem:[%s4235_s8 + $0x18] sm:$0xff] (!%p346_p10)  ;;  %vm410_vm0 = vcmask (!%p346_p10), 7168   ;;  %vm1707_vm1 = vcmask (!%p346_p10), 130048   ;;  %vm2108_vm2 = vcmask (!%p346_p10), 130112  }
  0x14   : > { %v3418_v14 = vld [vmem:[%s4235_s8 + $0x30] sm:$0xff] (!%p346_p10)  ;;  %v3457_v20 = vld [vmem:[%s4235_s8 + $0x28] sm:$0xff] (!%p346_p10)  ;;  %v3485_v23 = vld [vmem:[%s4235_s8 + $0x38] sm:$0xff] (!%p346_p10)  ;;  %vm2115_vm3 = vcmask (!%p346_p10), 195712   ;;  %vm2122_vm4 = vcmask (!%p346_p10), 261312   ;;  %vm2129_vm5 = vcmask (!%p346_p10), 326912  }
  0x15   : > { %v3430_v16 = vld [vmem:[%s4235_s8 + $0x10] sm:$0xff] (!%p346_p10)  ;;  %v3473_v22 = vld [vmem:[%s4235_s8 + $0x68] sm:$0xff] (!%p346_p10)  ;;  %v3505_v25 = vld [vmem:[%s4235_s8 + $0x58] sm:$0xff] (!%p346_p10)  ;;  %vm2136_vm6 = vcmask (!%p346_p10), 392512   ;;  %vm2143_vm7 = vcmask (!%p346_p10), 458112   ;;  %vm2150_vm8 = vcmask (!%p346_p10), 523712  }
  0x16   : > { %571 = vperm.xlu0 (!%p346_p10), %3036, %v3342_v3   ;;  %515 = vperm.xlu1 (!%p346_p10), %3035, %v3347_v4   ;;  %v3465_v21 = vld [vmem:[%s4235_s8 + $0x50] sm:$0xff] (!%p346_p10)  ;;  %v3497_v24 = vld [vmem:[%s4235_s8 + $0x48] sm:$0xff] (!%p346_p10)  ;;  %v3515_v26 = vld [vmem:[%s4235_s8 + $0x78] sm:$0xff] (!%p346_p10)  ;;  %vm2157_vm9 = vcmask (!%p346_p10), 589312   ;;  %vm2164_vm10 = vcmask (!%p346_p10), 654912   ;;  %vm2171_vm11 = vcmask (!%p346_p10), 720512  }
  0x17   : > { %v3524_v29 = vld [vmem:[%s4235_s8 + $0x40] sm:$0xff] (!%p346_p10)  ;;  %vm2178_vm12 = vcmask (!%p346_p10), 786112   ;;  %vm2185_vm13 = vcmask (!%p346_p10), 851712   ;;  %vm2192_vm14 = vcmask (!%p346_p10), 917312   ;;  %vm2199_vm15 = vcmask (!%p346_p10), 982912  }
  0x18   : > { %s3534_s11 = scalar_select %p391_p11, %s3200_s16, 1 }
  0x1a   : > { %583 = vperm.xlu0 %3036, %v3354_v5   ;;  %3037 = vset.pattern.permute.xlu1 %v3210_v1  ;;  %s2719_s12 = sshll.u32 %s3534_s11, 2  ;;  %s389_s11 = sand.u32 1, %s3192_s14  }
  0x1b   : > { %567 = vperm.xlu1 %3037, %v3347_v4   ;;  %s397_s22 = scalar_lea.vmem %s4241_s0, %s2719_s12  ;;  %s404_s24 = scalar_lea.vmem %s4228_s1, %s2719_s12 }
  0x1c   : > { %v3550_v39 = vld [vmem:[%s397_s22 + $0x1] ss:$0 sm:$0xff]  ;;  %v3552_v40 = vld [vmem:[%s397_s22] ss:$0 sm:$0xff]  ;;  %v3557_v45 = vld [vmem:[%s397_s22 + $0x2] ss:$0 sm:$0xff] }
  0x1d   : > { %s2780_s12 = sshll.u32 %s3200_s16, 4  ;;  %s390_s27 = scalar_lea.vmem [#allocation3], %s389_s11 }
  0x1e   : > { %3044 = vset.pattern.permute.xlu0 %v3211_v2  ;;  %s2633_s28 = sshll.u32 %s390_s27, 4  ;;  %s4180_s19 = scalar_lea.hbm %s4237_s10, %s2780_s12  ;;  %s4182_s28 = int_to_ptr.vmem [resolvable:$true] %s2633_s28 }
  0x1f   : > { %527 = vperm.xlu0 %3044, %v3361_v6   ;;  %3038 = vset.pattern.permute.xlu1 %v3212_v7  ;;  %s2621_s20 = scalar_lea.sflag [#allocation4], %s389_s11  ;;  %s3130_s22 = scalar_lea.vmem %s4182_s28, 16 }
  0x20   : > { %470 = vperm.xlu1 %3038, %v3342_v3   ;;  %p3131_p12 = scmp.ne.s32.totalorder %s4182_s28, %s3130_s22  ;;  %s3219_s16 = smov [#allocation3]  }
  0x22   : > { %p3132_p13 = pnand %p3131_p12, %p3315_p4 }
  0x23   : > { %539 = vperm.xlu0 %3044, %v3370_v8  }
  0x24   : > { %3039 = vset.pattern.permute.xlu1 %v3211_v2  ;;  %p3133_p0 = pneg %p3132_p13 }
  0x25   : > { %519 = vperm.xlu1 %3039, %v3342_v3  }
  0x27   : > { %3047 = vset.pattern.permute.xlu0 %v3212_v7 }
  0x28   : > { %460 = vperm.xlu0 %3047, %v3333_v0  }
  0x29   : > { %523 = vperm.xlu1 %3039, %v3378_v9  }
  0x2c   : > { %465 = vperm.xlu0 %3047, %v3347_v4  }
  0x2d   : > { %3040 = vset.pattern.permute.xlu1 %v3210_v1 }
  0x2e   : > { %575 = vperm.xlu1 %3040, %v3378_v9  }
  0x30   : > { %475 = vperm.xlu0 %3047, %v3378_v9  }
  0x32   : > { %3041 = vset.pattern.permute.xlu1 %v3212_v7 }
  0x33   : > { %620 = vperm.xlu1 %3041, %v3390_v10  }
  0x34   : > { %625 = vperm.xlu0 %3047, %v3396_v11  }
  0x37   : > { %480 = vperm.xlu1 %3041, %v3361_v6  }
  0x38   : > { %490 = vperm.xlu0 %3047, %v3403_v12  }
  0x3b   : > { %485 = vperm.xlu1 %3041, %v3354_v5  }
  0x3c   : > { %640 = vperm.xlu0 %3047, %v3410_v13  }
  0x3f   : > { %3042 = vset.pattern.permute.xlu1 %v3211_v2 }
  0x40   : > { %531 = vperm.xlu1 %3042, %v3354_v5   ;;  %650 = vperm.xlu0 %3047, %v3418_v14  }
  0x44   : > { %3043 = vset.pattern.permute.xlu1 %v3210_v1  ;;  %3055 = vset.pattern.permute.xlu0 %v3213_v15 }
  0x45   : > { %579 = vperm.xlu1 %3043, %v3361_v6   ;;  %734 = vperm.xlu0 %3055, %v3342_v3  }
  0x49   : > { %3045 = vset.pattern.permute.xlu1 %v3212_v7  ;;  %746 = vperm.xlu0 %3055, %v3354_v5  }
  0x4a   : > { %630 = vperm.xlu1 %3045, %v3430_v16  }
  0x4d   : > { %3061 = vset.pattern.permute.xlu0 %v3214_v18 }
  0x4e   : > { %635 = vperm.xlu1 %3045, %v3438_v17   ;;  %686 = vperm.xlu0 %3061, %v3347_v4  }
  0x52   : > { %495 = vperm.xlu1 %3045, %v3370_v8   ;;  %698 = vperm.xlu0 %3061, %v3361_v6  }
  0x56   : > { %3046 = vset.pattern.permute.xlu1 %v3211_v2  ;;  %710 = vperm.xlu0 %3061, %v3370_v8  }
  0x57   : > { %535 = vperm.xlu1 %3046, %v3403_v12  }
  0x5a   : > { %3065 = vset.pattern.permute.xlu0 %v3215_v19 }
  0x5b   : > { %3048 = vset.pattern.permute.xlu1 %v3210_v1  ;;  %782 = vperm.xlu0 %3065, %v3347_v4  }
  0x5c   : > { %587 = vperm.xlu1 %3048, %v3403_v12  }
  0x5f   : > { %790 = vperm.xlu0 %3065, %v3378_v9  }
  0x60   : > { %591 = vperm.xlu1 %3048, %v3370_v8  }
  0x63   : > { %802 = vperm.xlu0 %3065, %v3403_v12  }
  0x64   : > { %3049 = vset.pattern.permute.xlu1 %v3212_v7 }
  0x65   : > { %645 = vperm.xlu1 %3049, %v3457_v20  }
  0x67   : > { %3067 = vset.pattern.permute.xlu0 %v3212_v7 }
  0x68   : > { %845 = vperm.xlu0 %3067, %v3465_v21  }
  0x69   : > { %3050 = vset.pattern.permute.xlu1 %v3214_v18 }
  0x6a   : > { %682 = vperm.xlu1 %3050, %v3333_v0  }
  0x6c   : > { %860 = vperm.xlu0 %3067, %v3473_v22  }
  0x6e   : > { %3051 = vset.pattern.permute.xlu1 %v3213_v15 }
  0x6f   : > { %726 = vperm.xlu1 %3051, %v3333_v0  }
  0x70   : > { %3070 = vset.pattern.permute.xlu0 %v3211_v2 }
  0x71   : > { %923 = vperm.xlu0 %3070, %v3390_v10  }
  0x73   : > { %730 = vperm.xlu1 %3051, %v3347_v4  }
  0x75   : > { %938 = vperm.xlu0 %3070, %v3438_v17  }
  0x77   : > { %3052 = vset.pattern.permute.xlu1 %v3212_v7 }
  0x78   : > { %655 = vperm.xlu1 %3052, %v3485_v23  }
  0x79   : > { %948 = vperm.xlu0 %3070, %v3457_v20  }
  0x7c   : > { %3053 = vset.pattern.permute.xlu1 %v3215_v19 }
  0x7d   : > { %778 = vperm.xlu1 %3053, %v3333_v0   ;;  %958 = vperm.xlu0 %3070, %v3485_v23  }
  0x81   : > { %3054 = vset.pattern.permute.xlu1 %v3214_v18  ;;  %966 = vperm.xlu0 %3070, %v3497_v24  }
  0x82   : > { %690 = vperm.xlu1 %3054, %v3342_v3  }
  0x85   : > { %974 = vperm.xlu0 %3070, %v3505_v25  }
  0x86   : > { %694 = vperm.xlu1 %3054, %v3378_v9  }
  0x89   : > { %982 = vperm.xlu0 %3070, %v3473_v22  }
  0x8a   : > { %3056 = vset.pattern.permute.xlu1 %v3213_v15 }
  0x8b   : > { %738 = vperm.xlu1 %3056, %v3378_v9  }
  0x8d   : > { %990 = vperm.xlu0 %3070, %v3515_v26  }
  0x8f   : > { %3057 = vset.pattern.permute.xlu1 %v3215_v19 }
  0x90   : > { %786 = vperm.xlu1 %3057, %v3342_v3  }
  0x91   : > { %v512_v27 = vpop.permute.xlu1 %511  ;;  %v564_v28 = vpop.permute.xlu0 %563  ;;  %3073 = vset.pattern.permute.xlu0 %v3210_v1 }
  0x92   : > { %v542_v43 = vmul.f32 %v3550_v39, %v512_v27  ;;  %v594_v48 = vmul.f32 %v3557_v45, %v564_v28  ;;  %v3581_v27 = vld [vmem:[%s4235_s8 + $0x60] sm:$0xff] }
  0x94   : > { %3058 = vset.pattern.permute.xlu1 %v3212_v7 }
  0x95   : > { %835 = vperm.xlu1 %3058, %v3524_v29   ;;  %v516_v30 = vpop.permute.xlu1 %515  ;;  %v572_v31 = vpop.permute.xlu0 %571 }
  0x96   : > { %v543_v46 = vmul.f32 %v3550_v39, %v516_v30 }
  0x99   : > { %840 = vperm.xlu1 %3058, %v3497_v24   ;;  %v3529_v32 = vpop.permute.xlu0 %583 }
  0x9a   : > { %v568_v33 = vpop.permute.xlu1 %567 }
  0x9b   : > { %v595_v53 = vmul.f32 %v3557_v45, %v568_v33 }
  0x9d   : > { %3059 = vset.pattern.permute.xlu1 %v3214_v18 }
  0x9e   : > { %702 = vperm.xlu1 %3059, %v3354_v5   ;;  %v3537_v34 = vpop.permute.xlu0 %527 }
  0x9f   : > { %v471_v35 = vpop.permute.xlu1 %470 }
  0xa2   : > { %3060 = vset.pattern.permute.xlu1 %v3213_v15  ;;  %v3541_v36 = vpop.permute.xlu0 %539 }
  0xa3   : > { %742 = vperm.xlu1 %3060, %v3361_v6  }
  0xa4   : > { %v520_v37 = vpop.permute.xlu1 %519 }
  0xa5   : > { %v544_v4 = vmul.f32 %v3550_v39, %v520_v37 }
  0xa7   : > { %v461_v38 = vpop.permute.xlu0 %460  ;;  %3062 = vset.pattern.permute.xlu1 %v3215_v19 }
  0xa8   : > { %794 = vperm.xlu1 %3062, %v3361_v6   ;;  %v524_v41 = vpop.permute.xlu1 %523  ;;  %v498_v42 = vmul.f32 %v3552_v40, %v461_v38 }
  0xaa   : > { %v550_v49 = vadd.f32 %v542_v43, %v498_v42 }
  0xab   : > { %v466_v44 = vpop.permute.xlu0 %465 }
  0xac   : > { %v499_v47 = vmul.f32 %v3552_v40, %v466_v44  ;;  %798 = vperm.xlu1 %3062, %v3354_v5   ;;  %v602_v54 = vadd.f32 %v594_v48, %v550_v49  ;;  %v500_v5 = vmul.f32 %v3552_v40, %v471_v35  ;;  %v546_v48 = vmul.f32 %v3550_v39, %v3537_v34 }
  0xad   : > { %v576_v50 = vpop.permute.xlu1 %575 }
  0xae   : > { %v551_v51 = vadd.f32 %v543_v46, %v499_v47  ;;  %v597_v30 = vmul.f32 %v3557_v45, %v576_v50  ;;  %v3076_v47 = vld [vmem:[%s4230_s3] sm:$0xff]  }
  0xaf   : > { %v476_v52 = vpop.permute.xlu0 %475  ;;  %2875 = vmatprep.mubr.bf16.mxu0 %v3076_v47 }
  0xb0   : > { %3063 = vset.pattern.permute.xlu1 %v3212_v7  ;;  %v603_v56 = vadd.f32 %v595_v53, %v551_v51  ;;  %v501_v6 = vmul.f32 %v3552_v40, %v476_v52 }
  0xb1   : > { %850 = vperm.xlu1 %3063, %v3505_v25  }
  0xb2   : > { %v621_v55 = vpop.permute.xlu1 %620 }
  0xb3   : > { %v658_v57 = vadd.f32 %v621_v55, %v602_v54  ;;  %v626_v58 = vpop.permute.xlu0 %625  ;;  %v599_v55 = vmul.f32 %v3557_v45, %v3529_v32 }
  0xb4   : > { %v659_v59 = vadd.f32 %v626_v58, %v603_v56 }
  0xb5   : > { %v666_v60 = vmax.f32 %v658_v57, 0.0  ;;  %3064 = vset.pattern.permute.xlu1 %v3214_v18  ;;  %v552_v18 = vadd.f32 %v544_v4, %v500_v5 }
  0xb6   : > { %v667_v61 = vmax.f32 %v659_v59, 0.0  ;;  %706 = vperm.xlu1 %3064, %v3403_v12   ;;  %v481_v62 = vpop.permute.xlu1 %480 }
  0xb7   : > { %v502_v49 = vmul.f32 %v3552_v40, %v481_v62  ;;  %v491_v50 = vpop.permute.xlu0 %490 }
  0xb8   : > { %v905_v63 = vpack.c.bf16 %v667_v61, %v666_v60  ;;  %v504_v32 = vmul.f32 %v3552_v40, %v491_v50 }
  0xb9   : > { %v554_v53 = vadd.f32 %v546_v48, %v502_v49 }
  0xba   : > { %3066 = vset.pattern.permute.xlu1 %v3213_v15  ;;  %v486_v0 = vpop.permute.xlu1 %485  ;;  %2859 = vmatprep.subr.bf16.mxu0 %v905_v63  ;;  %v596_v15 = vmul.f32 %v3557_v45, %v572_v31  ;;  %v3589_v31 = vld [vmem:[%s4235_s8 + $0x70] sm:$0xff] }
  0xbb   : > { %750 = vperm.xlu1 %3066, %v3403_v12   ;;  %2860 = vmatpush3.bf16.msra.mxu0 %v905_v63  ;;  %v545_v12 = vmul.f32 %v3550_v39, %v524_v41  ;;  %v503_v54 = vmul.f32 %v3552_v40, %v486_v0  ;;  %v641_v58 = vpop.permute.xlu0 %640 }
  0xbd   : > { %v553_v28 = vadd.f32 %v545_v12, %v501_v6 }
  0xbf   : > { %754 = vperm.xlu1 %3066, %v3370_v8   ;;  %v532_v3 = vpop.permute.xlu1 %531  ;;  %v605_v35 = vadd.f32 %v597_v30, %v553_v28  ;;  %v651_v6 = vpop.permute.xlu0 %650 }
  0xc0   : > { %v547_v51 = vmul.f32 %v3550_v39, %v532_v3 }
  0xc2   : > { %v555_v34 = vadd.f32 %v547_v51, %v503_v54  ;;  %v3632_v51 = vld [vmem:[%s404_s24] ss:$0 sm:$0xff] }
  0xc3   : > { %3068 = vset.pattern.permute.xlu1 %v3215_v19 }
  0xc4   : > { %806 = vperm.xlu1 %3068, %v3370_v8   ;;  %v580_v9 = vpop.permute.xlu1 %579  ;;  %v604_v8 = vadd.f32 %v596_v15, %v552_v18  ;;  %v607_v60 = vadd.f32 %v599_v55, %v555_v34  ;;  %v549_v18 = vmul.f32 %v3550_v39, %v3541_v36  ;;  %v3637_v34 = vld [vmem:[%s404_s24 + $0x2] ss:$0 sm:$0xff] }
  0xc8   : > { %3069 = vset.pattern.permute.xlu1 %v3212_v7 }
  0xc9   : > { %855 = vperm.xlu1 %3069, %v3581_v27   ;;  %v631_v19 = vpop.permute.xlu1 %630 }
  0xca   : > { %v660_v33 = vadd.f32 %v631_v19, %v604_v8  ;;  %v735_v8 = vpop.permute.xlu0 %734 }
  0xcc   : > { %v668_v41 = vmax.f32 %v660_v33, 0.0 }
  0xcd   : > { %865 = vperm.xlu1 %3069, %v3589_v31   ;;  %v636_v37 = vpop.permute.xlu1 %635 }
  0xce   : > { %v661_v38 = vadd.f32 %v636_v37, %v605_v35 }
  0xd0   : > { %v669_v42 = vmax.f32 %v661_v38, 0.0 }
  0xd1   : > { %870 = vperm.xlu1 %3069, %v3515_v26   ;;  %v496_v43 = vpop.permute.xlu1 %495 }
  0xd2   : > { %v906_v44 = vpack.c.bf16 %v669_v42, %v668_v41  ;;  %v505_v12 = vmul.f32 %v3552_v40, %v496_v43  ;;  %v3621_v42 = vpop.permute.xlu0 %746 }
  0xd4   : > { %2861 = vmatprep.subr.bf16.mxu0 %v906_v44  ;;  %v557_v35 = vadd.f32 %v549_v18, %v505_v12 }
  0xd5   : > { %2862 = vmatpush3.bf16.msra.mxu0 %v906_v44  ;;  %3071 = vset.pattern.permute.xlu1 %v3211_v2  ;;  %v598_v2 = vmul.f32 %v3557_v45, %v580_v9 }
  0xd6   : > { %v536_v46 = vpop.permute.xlu1 %535  ;;  %928 = vperm.xlu1 %3071, %v3396_v11  }
  0xd7   : > { %v606_v56 = vadd.f32 %v598_v2, %v554_v53  ;;  %v548_v5 = vmul.f32 %v3550_v39, %v536_v46  ;;  %v687_v46 = vpop.permute.xlu0 %686 }
  0xd8   : > { %v714_v2 = vmul.f32 %v3632_v51, %v687_v46 }
  0xd9   : > { %v662_v59 = vadd.f32 %v641_v58, %v606_v56  ;;  %v556_v28 = vadd.f32 %v548_v5, %v504_v32 }
  0xda   : > { %933 = vperm.xlu1 %3071, %v3430_v16  }
  0xdb   : > { %v588_v52 = vpop.permute.xlu1 %587  ;;  %v670_v63 = vmax.f32 %v662_v59, 0.0  ;;  %v699_v47 = vpop.permute.xlu0 %698 }
  0xdc   : > { %v600_v9 = vmul.f32 %v3557_v45, %v588_v52 }
  0xde   : > { %943 = vperm.xlu1 %3071, %v3410_v13   ;;  %v608_v19 = vadd.f32 %v600_v9, %v556_v28 }
  0xdf   : > { %v592_v57 = vpop.permute.xlu1 %591  ;;  %v3623_v49 = vpop.permute.xlu0 %710 }
  0xe0   : > { %v601_v30 = vmul.f32 %v3557_v45, %v592_v57  ;;  %v664_v37 = vadd.f32 %v651_v6, %v608_v19 }
  0xe2   : > { %953 = vperm.xlu1 %3071, %v3418_v14   ;;  %v609_v38 = vadd.f32 %v601_v30, %v557_v35  ;;  %v672_v39 = vmax.f32 %v664_v37, 0.0 }
  0xe3   : > { %v783_v55 = vpop.permute.xlu0 %782 }
  0xe4   : > { %v646_v61 = vpop.permute.xlu1 %645 }
  0xe5   : > { %v663_v62 = vadd.f32 %v646_v61, %v607_v60  ;;  %v810_v60 = vmul.f32 %v3637_v34, %v783_v55 }
  0xe6   : > { %962 = vperm.xlu1 %3071, %v3524_v29  }
  0xe7   : > { %v671_v3 = vmax.f32 %v663_v62, 0.0  ;;  %v791_v18 = vpop.permute.xlu0 %790 }
  0xe9   : > { %v683_v0 = vpop.permute.xlu1 %682  ;;  %v907_v4 = vpack.c.bf16 %v671_v3, %v670_v63 }
  0xea   : > { %970 = vperm.xlu1 %3071, %v3465_v21   ;;  %v713_v56 = vmul.f32 %v3632_v51, %v683_v0 }
  0xeb   : > { %2863 = vmatprep.subr.bf16.mxu0 %v907_v4  ;;  %v803_v19 = vpop.permute.xlu0 %802 }
  0xec   : > { %2864 = vmatpush3.bf16.msra.mxu0 %v907_v4 }
  0xee   : > { %v727_v15 = vpop.permute.xlu1 %726  ;;  %978 = vperm.xlu1 %3071, %v3581_v27  }
  0xf2   : > { %v731_v33 = vpop.permute.xlu1 %730  ;;  %986 = vperm.xlu1 %3071, %v3589_v31  }
  0xf6   : > { %3072 = vset.pattern.permute.xlu1 %v3210_v1  ;;  %v3630_v1 = vld [vmem:[%s404_s24 + $0x1] ss:$0 sm:$0xff]  ;;  %s3134_s24 = sshll.u32 %s3219_s16, 4  ;;  %s3135_s24 = int_to_ptr.vmem [resolvable:$false] %s3134_s24 }
  0xf7   : > { %v656_v41 = vpop.permute.xlu1 %655  ;;  %v757_v52 = vmul.f32 %v3630_v1, %v727_v15  ;;  %v758_v53 = vmul.f32 %v3630_v1, %v731_v33  ;;  %v759_v12 = vmul.f32 %v3630_v1, %v735_v8  ;;  %s3136_s0 = scalar_lea.vmem %s3135_s24, 32  ;;  %p3137_p1 = scmp.lt.s32.totalorder %s4182_s28, %s3135_s24 }
  0xf8   : > { %v665_v36 = vadd.f32 %v656_v41, %v609_v38  ;;  %p3138_p2 = scmp.lt.s32.totalorder %s3136_s0, %s3130_s22 }
  0xf9   : > { %v765_v58 = vadd.f32 %v757_v52, %v713_v56  ;;  %v766_v59 = vadd.f32 %v758_v53, %v714_v2 }
  0xfa   : > { %v673_v40 = vmax.f32 %v665_v36, 0.0  ;;  %v812_v36 = vmul.f32 %v3637_v34, %v791_v18  ;;  %p3139_p3 = por %p3138_p2, %p3137_p1 }
  0xfb   : > { %v818_v3 = vadd.f32 %v810_v60, %v766_v59 }
  0xfc   : > { %v779_v43 = vpop.permute.xlu1 %778  ;;  %v908_v44 = vpack.c.bf16 %v673_v40, %v672_v39  ;;  %p3140_p5 = pnand %p3139_p3, %p3133_p0 }
  0xfd   : > { %v809_v57 = vmul.f32 %v3637_v34, %v779_v43  ;;  %v846_v43 = vpop.permute.xlu0 %845 }
  0xfe   : > { %2865 = vmatprep.subr.bf16.mxu0 %v908_v44 }
  0xff   : > { %2866 = vmatpush3.bf16.msra.mxu0 %v908_v44  ;;  %v817_v62 = vadd.f32 %v809_v57, %v765_v58  ;;  %v717_v58 = vmul.f32 %v3632_v51, %v699_v47 }
 0x101   : > { %v691_v45 = vpop.permute.xlu1 %690 }
 0x102   : > { %v715_v28 = vmul.f32 %v3632_v51, %v691_v45 }
 0x104   : > { %v767_v37 = vadd.f32 %v759_v12, %v715_v28 }
 0x105   : > { %v695_v48 = vpop.permute.xlu1 %694 }
 0x106   : > { %v716_v38 = vmul.f32 %v3632_v51, %v695_v48  ;;  %v762_v48 = vmul.f32 %v3630_v1, %v3621_v42 }
 0x10a   : > { %v739_v50 = vpop.permute.xlu1 %738 }
 0x10b   : > { %v760_v30 = vmul.f32 %v3630_v1, %v739_v50 }
 0x10d   : > { %v768_v41 = vadd.f32 %v760_v30, %v716_v38 }
 0x10f   : > { %v787_v54 = vpop.permute.xlu1 %786  ;;  %v820_v46 = vadd.f32 %v812_v36, %v768_v41 }
 0x110   : > { %v811_v33 = vmul.f32 %v3637_v34, %v787_v54 }
 0x112   : > { %v819_v39 = vadd.f32 %v811_v33, %v767_v37 }
 0x114   : > { %v836_v61 = vpop.permute.xlu1 %835  ;;  %v875_v44 = vadd.f32 %v846_v43, %v819_v39 }
 0x115   : > { %v873_v63 = vadd.f32 %v836_v61, %v817_v62 }
 0x116   : > { %v883_v45 = vmax.f32 %v875_v44, 0.0 }
 0x117   : > { %v881_v5 = vmax.f32 %v873_v63, 0.0 }
 0x118   : > { %v841_v4 = vpop.permute.xlu1 %840 }
 0x119   : > { %v874_v32 = vadd.f32 %v841_v4, %v818_v3  ;;  %v861_v3 = vpop.permute.xlu0 %860 }
 0x11b   : > { %v882_v6 = vmax.f32 %v874_v32, 0.0 }
 0x11d   : > { %v703_v9 = vpop.permute.xlu1 %702  ;;  %v909_v15 = vpack.c.bf16 %v882_v6, %v881_v5 }
 0x11e   : > { %v718_v55 = vmul.f32 %v3632_v51, %v703_v9 }
 0x11f   : > { %2867 = vmatprep.subr.bf16.mxu0 %v909_v15 }
 0x120   : > { %2868 = vmatpush3.bf16.msra.mxu0 %v909_v15  ;;  %v770_v59 = vadd.f32 %v762_v48, %v718_v55  ;;  %v815_v15 = vmul.f32 %v3637_v34, %v803_v19  ;;  %v1213_v48 = vld [vmem:[%s4235_s8 + $0x98] sm:$0xff]  ;;  %v1214_v55 = vld [vmem:[%s4235_s8 + $0xa0] sm:$0xff] }
 0x122   : > { %v743_v0 = vpop.permute.xlu1 %742 }
 0x123   : > { %v761_v60 = vmul.f32 %v3630_v1, %v743_v0  ;;  %v720_v0 = vmul.f32 %v3632_v51, %v3623_v49  ;;  %v3077_v49 = vld [vmem:[%s4230_s3 + $0x8] sm:$0xff]  }
 0x125   : > { %v769_v4 = vadd.f32 %v761_v60, %v717_v58 }
 0x127   : > { %v795_v35 = vpop.permute.xlu1 %794 }
 0x128   : > { %v813_v61 = vmul.f32 %v3637_v34, %v795_v35 }
 0x12a   : > { %v821_v6 = vadd.f32 %v813_v61, %v769_v4 }
 0x12b   : > { %v799_v40 = vpop.permute.xlu1 %798 }
 0x12c   : > { %v814_v57 = vmul.f32 %v3637_v34, %v799_v40 }
 0x12e   : > { %v822_v62 = vadd.f32 %v814_v57, %v770_v59 }
 0x130   : > { %v851_v8 = vpop.permute.xlu1 %850  ;;  %v878_v5 = vadd.f32 %v861_v3, %v822_v62 }
 0x131   : > { %v876_v2 = vadd.f32 %v851_v8, %v820_v46  ;;  %v3080_v46 = vld [vmem:[%s4230_s3 + $0x20] sm:$0xff]   ;;  %v3081_v8 = vld [vmem:[%s4230_s3 + $0x28] sm:$0xff]  }
 0x132   : > { %v886_v28 = vmax.f32 %v878_v5, 0.0 }
 0x133   : > { %v884_v52 = vmax.f32 %v876_v2, 0.0  ;;  %v3082_v2 = vld [vmem:[%s4230_s3 + $0x30] sm:$0xff]  }
 0x135   : > { %v707_v53 = vpop.permute.xlu1 %706  ;;  %v910_v50 = vpack.c.bf16 %v884_v52, %v883_v45  ;;  %v3083_v45 = vld [vmem:[%s4230_s3 + $0x38] sm:$0xff]   ;;  %v1210_v52 = vld [vmem:[%s4235_s8 + $0x80] sm:$0xff] }
 0x136   : > { %v719_v42 = vmul.f32 %v3632_v51, %v707_v53  ;;  %v3078_v51 = vld [vmem:[%s4230_s3 + $0x10] sm:$0xff]   ;;  %1308 = vperm.xlu1 %3072, %v1210_v52   ;;  %v1211_v53 = vld [vmem:[%s4235_s8 + $0x88] sm:$0xff] }
 0x137   : > { %2869 = vmatprep.subr.bf16.mxu0 %v910_v50  ;;  %1313 = vperm.xlu0 %3073, %v1211_v53  }
 0x138   : > { %2870 = vmatpush3.bf16.msra.mxu0 %v910_v50  ;;  %v3084_v50 = vld [vmem:[%s4231_s4] sm:$0xff]  }
 0x139   : > { %2907 = vmatprep.mubr.bf16.mxu1 %v3084_v50 }
 0x13a   : > { %v751_v54 = vpop.permute.xlu1 %750  ;;  %1228 = vperm.xlu1 %3072, %v3390_v10   ;;  %v1215_v10 = vld [vmem:[%s4235_s8 + $0xa8] sm:$0xff] }
 0x13b   : > { %v763_v32 = vmul.f32 %v3630_v1, %v751_v54  ;;  %v1212_v54 = vld [vmem:[%s4235_s8 + $0x90] sm:$0xff] }
 0x13c   : > { %1318 = vperm.xlu0 %3073, %v1212_v54  }
 0x13d   : > { %v771_v18 = vadd.f32 %v763_v32, %v719_v42 }
 0x13e   : > { %v755_v56 = vpop.permute.xlu1 %754  ;;  %1233 = vperm.xlu1 %3072, %v3396_v11   ;;  %v1216_v11 = vld [vmem:[%s4235_s8 + $0xb0] sm:$0xff] }
 0x13f   : > { %v764_v47 = vmul.f32 %v3630_v1, %v755_v56  ;;  %v823_v38 = vadd.f32 %v815_v15, %v771_v18 }
 0x140   : > { %1238 = vperm.xlu0 %3073, %v3430_v16   ;;  %v1217_v16 = vld [vmem:[%s4235_s8 + $0xb8] sm:$0xff] }
 0x141   : > { %v772_v37 = vadd.f32 %v764_v47, %v720_v0 }
 0x142   : > { %1323 = vperm.xlu1 %3072, %v1213_v48  }
 0x143   : > { %v807_v63 = vpop.permute.xlu1 %806 }
 0x144   : > { %v816_v30 = vmul.f32 %v3637_v34, %v807_v63  ;;  %v3079_v34 = vld [vmem:[%s4230_s3 + $0x18] sm:$0xff]   ;;  %1328 = vperm.xlu0 %3073, %v1214_v55  }
 0x146   : > { %v824_v39 = vadd.f32 %v816_v30, %v772_v37  ;;  %1243 = vperm.xlu1 %3072, %v3438_v17   ;;  %v1218_v17 = vld [vmem:[%s4235_s8 + $0xc0] sm:$0xff] }
 0x148   : > { %v856_v9 = vpop.permute.xlu1 %855  ;;  %1248 = vperm.xlu0 %3073, %v3410_v13   ;;  %v1219_v13 = vld [vmem:[%s4235_s8 + $0xc8] sm:$0xff] }
 0x149   : > { %v877_v12 = vadd.f32 %v856_v9, %v821_v6 }
 0x14a   : > { %1333 = vperm.xlu1 %3072, %v1215_v10  }
 0x14b   : > { %v885_v33 = vmax.f32 %v877_v12, 0.0 }
 0x14c   : > { %v866_v35 = vpop.permute.xlu1 %865  ;;  %1338 = vperm.xlu0 %3073, %v1216_v11  }
 0x14d   : > { %v911_v41 = vpack.c.bf16 %v886_v28, %v885_v33  ;;  %v879_v36 = vadd.f32 %v866_v35, %v823_v38 }
 0x14e   : > { %1253 = vperm.xlu1 %3072, %v3457_v20   ;;  %v1220_v20 = vld [vmem:[%s4235_s8 + $0xd0] sm:$0xff] }
 0x14f   : > { %2871 = vmatprep.subr.bf16.mxu0 %v911_v41  ;;  %v887_v43 = vmax.f32 %v879_v36, 0.0 }
 0x150   : > { %v871_v40 = vpop.permute.xlu1 %870  ;;  %2872 = vmatpush3.bf16.msra.mxu0 %v911_v41  ;;  %1258 = vperm.xlu0 %3073, %v3418_v14   ;;  %v1221_v14 = vld [vmem:[%s4235_s8 + $0xd8] sm:$0xff] }
 0x151   : > { %v880_v19 = vadd.f32 %v871_v40, %v824_v39 }
 0x152   : > { %1343 = vperm.xlu1 %3072, %v1217_v16  }
 0x153   : > { %v888_v1 = vmax.f32 %v880_v19, 0.0 }
 0x154   : > { %1348 = vperm.xlu0 %3073, %v1218_v17  }
 0x155   : > { %v912_v44 = vpack.c.bf16 %v888_v1, %v887_v43 }
 0x156   : > { %1263 = vperm.xlu1 %3072, %v3485_v23   ;;  %v1222_v23 = vld [vmem:[%s4235_s8 + $0xe0] sm:$0xff] }
 0x157   : > { %2873 = vmatprep.subr.bf16.mxu0 %v912_v44 }
 0x158   : > { %2874 = vmatpush3.bf16.msra.mxu0 %v912_v44  ;;  %1268 = vperm.xlu0 %3073, %v3524_v29   ;;  %v1223_v29 = vld [vmem:[%s4235_s8 + $0xe8] sm:$0xff] }
 0x15a   : > { %1353 = vperm.xlu1 %3072, %v1219_v13  }
 0x15b   : > { %2876 = vmatmul.mubr.bf16.vlgmr.msra.gmra.mrb[0].mxu0 %v3077_v49 }
 0x15c   : > { %2879 = vmatprep.mubr.bf16.mxu0 %v3078_v51  ;;  %1358 = vperm.xlu0 %3073, %v1220_v20  }
 0x15e   : > { %1273 = vperm.xlu1 %3072, %v3497_v24   ;;  %v1224_v24 = vld [vmem:[%s4235_s8 + $0xf0] sm:$0xff] }
 0x160   : > { %1278 = vperm.xlu0 %3073, %v3465_v21   ;;  %v1225_v21 = vld [vmem:[%s4235_s8 + $0xf8] sm:$0xff] }
 0x162   : > { %1363 = vperm.xlu1 %3072, %v1221_v14  }
 0x163   : > { %2880 = vmatmul.mubr.bf16.gmra.mrb[4].mxu0 %v3079_v34 }
 0x164   : > { %2883 = vmatprep.mubr.bf16.mxu0 %v3080_v46  ;;  %1368 = vperm.xlu0 %3073, %v1222_v23  }
 0x166   : > { %1283 = vperm.xlu1 %3072, %v3505_v25   ;;  %v929_v25 = vpop.permute.xlu1 %928 }
 0x168   : > { %1288 = vperm.xlu0 %3073, %v3581_v27   ;;  %v924_v27 = vpop.permute.xlu0 %923 }
 0x16a   : > { %1373 = vperm.xlu1 %3072, %v1223_v29   ;;  %v934_v56 = vpop.permute.xlu1 %933 }
 0x16b   : > { %2884 = vmatmul.mubr.bf16.gmra.mrb[8].mxu0 %v3081_v8 }
 0x16c   : > { %2887 = vmatprep.mubr.bf16.mxu0 %v3082_v2  ;;  %1378 = vperm.xlu0 %3073, %v1224_v24   ;;  %v939_v57 = vpop.permute.xlu0 %938 }
 0x16e   : > { %1293 = vperm.xlu1 %3072, %v3473_v22   ;;  %v944_v58 = vpop.permute.xlu1 %943 }
 0x170   : > { %1298 = vperm.xlu0 %3073, %v3589_v31   ;;  %v949_v59 = vpop.permute.xlu0 %948 }
 0x172   : > { %1383 = vperm.xlu1 %3072, %v1225_v21   ;;  %v954_v22 = vpop.permute.xlu1 %953 }
 0x173   : > { %2888 = vmatmul.mubr.bf16.gmra.mrb[12].mxu0 %v3083_v45 }
 0x174   : > { %3075 = vset.pattern.permute.xlu0 %v3212_v7  ;;  %v959_v63 = vpop.permute.xlu0 %958 }
 0x176   : > { %1303 = vperm.xlu1 %3072, %v3515_v26   ;;  %v963_v6 = vpop.permute.xlu1 %962 }
 0x178   : > { %v967_v18 = vpop.permute.xlu0 %966 }
 0x17a   : > { %3074 = vset.pattern.permute.xlu1 %v3212_v7  ;;  %v971_v38 = vpop.permute.xlu1 %970 }
 0x17c   : > { %v975_v40 = vpop.permute.xlu0 %974 }
 0x17e   : > { %v979_v46 = vpop.permute.xlu1 %978 }
 0x180   : > { %v983_v53 = vpop.permute.xlu0 %982 }
 0x182   : > { %v987_v16 = vpop.permute.xlu1 %986 }
 0x184   : > { %v991_v23 = vpop.permute.xlu0 %990 }
 0x22e   : > { %v2877_v60 = vpop.f32.mrb[0].mxu0 }
 0x22f   : > { %v1084_v61 = vadd.f32 %v2877_v60, %v934_v56  ;;  %v1075_v62 = vpop.f32.mrb[1].mxu0 }
 0x230   : > { %v1076_v3 = vadd.f32 %v1075_v62, %v924_v27  ;;  %v2878_v31 = vpop.f32.mrb[2].mxu0  ;;  %v3086_v62 = vld [vmem:[%s4231_s4 + $0x10] sm:$0xff]  }
 0x231   : > { %v1087_v4 = vadd.f32 %v2878_v31, %v939_v57  ;;  %v1078_v32 = vpop.f32.mrb[3].mxu0  ;;  %v1140_v5 = vmax.f32 %v1084_v61, 0.0  ;;  %v3085_v61 = vld [vmem:[%s4231_s4 + $0x8] sm:$0xff]  }
 0x232   : > { %v1079_v26 = vadd.f32 %v1078_v32, %v929_v25  ;;  %v1138_v7 = vmax.f32 %v1076_v3, 0.0  ;;  %v3088_v3 = vld [vmem:[%s4231_s4 + $0x20] sm:$0xff]   ;;  %v3089_v31 = vld [vmem:[%s4231_s4 + $0x28] sm:$0xff]   ;;  %v3091_v32 = vld [vmem:[%s4231_s4 + $0x38] sm:$0xff]  }
 0x233   : > { %v1141_v42 = vmax.f32 %v1087_v4, 0.0  ;;  %v3090_v4 = vld [vmem:[%s4231_s4 + $0x30] sm:$0xff]  }
 0x234   : > { %v1139_v9 = vmax.f32 %v1079_v26, 0.0  ;;  %v3092_v26 = vld [vmem:[%s4231_s4 + $0x40] sm:$0xff]  }
 0x235   : > { %v1187_v15 = vpack.c.bf16 %v1141_v42, %v1140_v5  ;;  %v3093_v5 = vld [vmem:[%s4231_s4 + $0x48] sm:$0xff]   ;;  %v3094_v42 = vld [vmem:[%s4231_s4 + $0x50] sm:$0xff]  }
 0x236   : > { %v2881_v47 = vpop.f32.mrb[4].mxu0  ;;  %v1186_v12 = vpack.c.bf16 %v1139_v9, %v1138_v7  ;;  %v3096_v7 = vld [vmem:[%s4231_s4 + $0x60] sm:$0xff]   ;;  %v3097_v9 = vld [vmem:[%s4231_s4 + $0x68] sm:$0xff]  }
 0x237   : > { %v1100_v0 = vadd.f32 %v2881_v47, %v954_v22  ;;  %v1091_v28 = vpop.f32.mrb[5].mxu0  ;;  %v3797_v47 = vpop.permute.xlu1 %1308 }
 0x238   : > { %v1092_v30 = vadd.f32 %v1091_v28, %v944_v58  ;;  %v2882_v33 = vpop.f32.mrb[6].mxu0  ;;  %2891 = vmatprep.subr.bf16.mxu1 %v1186_v12 }
 0x239   : > { %v1103_v35 = vadd.f32 %v2882_v33, %v959_v63  ;;  %v1094_v37 = vpop.f32.mrb[7].mxu0  ;;  %2892 = vmatpush3.bf16.msra.mxu1 %v1186_v12  ;;  %v1144_v36 = vmax.f32 %v1100_v0, 0.0  ;;  %v3087_v63 = vld [vmem:[%s4231_s4 + $0x18] sm:$0xff]   ;;  %v3799_v0 = vpop.permute.xlu0 %1313 }
 0x23a   : > { %v1095_v41 = vadd.f32 %v1094_v37, %v949_v59  ;;  %2893 = vmatprep.subr.bf16.mxu1 %v1187_v15  ;;  %v1142_v19 = vmax.f32 %v1092_v30, 0.0  ;;  %v3216_v30 = vmov -inf  }
 0x23b   : > { %v1145_v39 = vmax.f32 %v1103_v35, 0.0  ;;  %v1229_v12 = vpop.permute.xlu1 %1228  ;;  %413 = vst.msk [vmem:[#allocation2 + $0x10] sm:$0xff] %vm410_vm0, %v3216_v30  ;;  %411 = vst.msk [vmem:[#allocation2] sm:$0xff] %vm410_vm0, %v3216_v30 }
 0x23c   : > { %v1143_v43 = vmax.f32 %v1095_v41, 0.0  ;;  %412 = vst.msk [vmem:[#allocation2 + $0x8] sm:$0xff] %vm410_vm0, %v3216_v30  ;;  %414 = vst.msk [vmem:[#allocation2 + $0x18] sm:$0xff] %vm410_vm0, %v3216_v30 }
 0x23d   : > { %v1189_v1 = vpack.c.bf16 %v1145_v39, %v1144_v36  ;;  %2894 = vmatpush3.bf16.msra.mxu1 %v1187_v15  ;;  %v3098_v15 = vld [vmem:[%s4231_s4 + $0x70] sm:$0xff]   ;;  %415 = vst.msk [vmem:[#allocation2 + $0x20] sm:$0xff] %vm410_vm0, %v3216_v30  ;;  %416 = vst.msk [vmem:[#allocation2 + $0x28] sm:$0xff] %vm410_vm0, %v3216_v30  ;;  %v3835_v33 = vpop.permute.xlu0 %1318 }
 0x23e   : > { %v1188_v44 = vpack.c.bf16 %v1143_v43, %v1142_v19  ;;  %v2885_v49 = vpop.f32.mrb[8].mxu0  ;;  %417 = vst.msk [vmem:[#allocation2 + $0x30] sm:$0xff] %vm410_vm0, %v3216_v30  ;;  %418 = vst.msk [vmem:[#allocation2 + $0x38] sm:$0xff] %vm410_vm0, %v3216_v30 }
 0x23f   : > { %v1116_v51 = vadd.f32 %v2885_v49, %v971_v38  ;;  %v1107_v34 = vpop.f32.mrb[9].mxu0  ;;  %v3801_v28 = vpop.permute.xlu1 %1233  ;;  %419 = vst.msk [vmem:[#allocation2 + $0x40] sm:$0xff] %vm410_vm0, %v3216_v30  ;;  %420 = vst.msk [vmem:[#allocation2 + $0x48] sm:$0xff] %vm410_vm0, %v3216_v30 }
 0x240   : > { %v1108_v8 = vadd.f32 %v1107_v34, %v963_v6  ;;  %v2886_v2 = vpop.f32.mrb[10].mxu0  ;;  %2895 = vmatprep.subr.bf16.mxu1 %v1188_v44  ;;  %v3095_v6 = vld [vmem:[%s4231_s4 + $0x58] sm:$0xff]   ;;  %421 = vst.msk [vmem:[#allocation2 + $0x50] sm:$0xff] %vm410_vm0, %v3216_v30  ;;  %422 = vst.msk [vmem:[#allocation2 + $0x58] sm:$0xff] %vm410_vm0, %v3216_v30 }
 0x241   : > { %v1119_v45 = vadd.f32 %v2886_v2, %v975_v40  ;;  %v1110_v52 = vpop.f32.mrb[11].mxu0  ;;  %2896 = vmatpush3.bf16.msra.mxu1 %v1188_v44  ;;  %v1148_v54 = vmax.f32 %v1116_v51, 0.0  ;;  %423 = vst.msk [vmem:[#allocation2 + $0x60] sm:$0xff] %vm410_vm0, %v3216_v30  ;;  %424 = vst.msk [vmem:[#allocation2 + $0x68] sm:$0xff] %vm410_vm0, %v3216_v30  ;;  %v1239_v37 = vpop.permute.xlu0 %1238 }
 0x242   : > { %v1111_v50 = vadd.f32 %v1110_v52, %v967_v18  ;;  %2897 = vmatprep.subr.bf16.mxu1 %v1189_v1  ;;  %v1146_v55 = vmax.f32 %v1108_v8, 0.0  ;;  %v3099_v18 = vld [vmem:[%s4231_s4 + $0x78] sm:$0xff]   ;;  %425 = vst.msk [vmem:[#allocation2 + $0x70] sm:$0xff] %vm410_vm0, %v3216_v30  ;;  %426 = vst.msk [vmem:[#allocation2 + $0x78] sm:$0xff] %vm410_vm0, %v3216_v30 }
 0x243   : > { %v1149_v48 = vmax.f32 %v1119_v45, 0.0  ;;  %427 = vst.msk [vmem:[#allocation2 + $0x80] sm:$0xff] %vm410_vm0, %v3216_v30  ;;  %428 = vst.msk [vmem:[#allocation2 + $0x88] sm:$0xff] %vm410_vm0, %v3216_v30  ;;  %v3837_v35 = vpop.permute.xlu1 %1323 }
 0x244   : > { %v1147_v10 = vmax.f32 %v1111_v50, 0.0  ;;  %429 = vst.msk [vmem:[#allocation2 + $0x90] sm:$0xff] %vm410_vm0, %v3216_v30  ;;  %430 = vst.msk [vmem:[#allocation2 + $0x98] sm:$0xff] %vm410_vm0, %v3216_v30 }
 0x245   : > { %v1191_v11 = vpack.c.bf16 %v1149_v48, %v1148_v54  ;;  %2898 = vmatpush3.bf16.msra.mxu1 %v1189_v1  ;;  %431 = vst.msk [vmem:[#allocation2 + $0xa0] sm:$0xff] %vm410_vm0, %v3216_v30  ;;  %432 = vst.msk [vmem:[#allocation2 + $0xa8] sm:$0xff] %vm410_vm0, %v3216_v30  ;;  %v3839_v41 = vpop.permute.xlu0 %1328 }
 0x246   : > { %v1190_v17 = vpack.c.bf16 %v1147_v10, %v1146_v55  ;;  %v2889_v13 = vpop.f32.mrb[12].mxu0  ;;  %433 = vst.msk [vmem:[#allocation2 + $0xb0] sm:$0xff] %vm410_vm0, %v3216_v30  ;;  %434 = vst.msk [vmem:[#allocation2 + $0xb8] sm:$0xff] %vm410_vm0, %v3216_v30 }
 0x247   : > { %v1132_v20 = vadd.f32 %v2889_v13, %v987_v16  ;;  %v1123_v14 = vpop.f32.mrb[13].mxu0  ;;  %435 = vst.msk [vmem:[#allocation2 + $0xc0] sm:$0xff] %vm410_vm0, %v3216_v30  ;;  %436 = vst.msk [vmem:[#allocation2 + $0xc8] sm:$0xff] %vm410_vm0, %v3216_v30  ;;  %v1244_v38 = vpop.permute.xlu1 %1243 }
 0x248   : > { %v1124_v29 = vadd.f32 %v1123_v14, %v979_v46  ;;  %v2890_v24 = vpop.f32.mrb[14].mxu0  ;;  %2899 = vmatprep.subr.bf16.mxu1 %v1190_v17  ;;  %437 = vst.msk [vmem:[#allocation2 + $0xd0] sm:$0xff] %vm410_vm0, %v3216_v30  ;;  %438 = vst.msk [vmem:[#allocation2 + $0xd8] sm:$0xff] %vm410_vm0, %v3216_v30 }
 0x249   : > { %v1135_v21 = vadd.f32 %v2890_v24, %v991_v23  ;;  %v1126_v25 = vpop.f32.mrb[15].mxu0  ;;  %2900 = vmatpush3.bf16.msra.mxu1 %v1190_v17  ;;  %v1152_v56 = vmax.f32 %v1132_v20, 0.0  ;;  %439 = vst.msk [vmem:[#allocation2 + $0xe0] sm:$0xff] %vm410_vm0, %v3216_v30  ;;  %440 = vst.msk [vmem:[#allocation2 + $0xe8] sm:$0xff] %vm410_vm0, %v3216_v30  ;;  %v1249_v39 = vpop.permute.xlu0 %1248 }
 0x24a   : > { %v1127_v27 = vadd.f32 %v1126_v25, %v983_v53  ;;  %2901 = vmatprep.subr.bf16.mxu1 %v1191_v11  ;;  %v1150_v58 = vmax.f32 %v1124_v29, 0.0  ;;  %441 = vst.msk [vmem:[#allocation2 + $0xf0] sm:$0xff] %vm410_vm0, %v3216_v30  ;;  %442 = vst.msk [vmem:[#allocation2 + $0xf8] sm:$0xff] %vm410_vm0, %v3216_v30 }
 0x24b   : > { %v1153_v57 = vmax.f32 %v1135_v21, 0.0  ;;  %v3841_v36 = vpop.permute.xlu1 %1333 }
 0x24c   : > { %v1151_v59 = vmax.f32 %v1127_v27, 0.0 }
 0x24d   : > { %v1193_v22 = vpack.c.bf16 %v1153_v57, %v1152_v56  ;;  %2902 = vmatpush3.bf16.msra.mxu1 %v1191_v11  ;;  %v3843_v19 = vpop.permute.xlu0 %1338 }
 0x24e   : > { %v1192_v60 = vpack.c.bf16 %v1151_v59, %v1150_v58 }
 0x24f   : > { %v1254_v40 = vpop.permute.xlu1 %1253 }
 0x250   : > { %2903 = vmatprep.subr.bf16.mxu1 %v1192_v60 }
 0x251   : > { %2904 = vmatpush3.bf16.msra.mxu1 %v1192_v60  ;;  %v1259_v1 = vpop.permute.xlu0 %1258 }
 0x252   : > { %2905 = vmatprep.subr.bf16.mxu1 %v1193_v22 }
 0x253   : > { %v3845_v43 = vpop.permute.xlu1 %1343 }
 0x255   : > { %2906 = vmatpush3.bf16.msra.mxu1 %v1193_v22  ;;  %v3847_v49 = vpop.permute.xlu0 %1348 }
 0x257   : > { %v1264_v44 = vpop.permute.xlu1 %1263 }
 0x258   : > { %2908 = vmatmul.mubr.bf16.vlgmr.msra.gmra.mrb[0].mxu1 %v3085_v61 }
 0x259   : > { %2911 = vmatprep.mubr.bf16.mxu1 %v3086_v62  ;;  %v1269_v34 = vpop.permute.xlu0 %1268 }
 0x25b   : > { %v3849_v51 = vpop.permute.xlu1 %1353 }
 0x25d   : > { %v3851_v8 = vpop.permute.xlu0 %1358 }
 0x25f   : > { %v1274_v46 = vpop.permute.xlu1 %1273 }
 0x260   : > { %2912 = vmatmul.mubr.bf16.gmra.mrb[4].mxu1 %v3087_v63 }
 0x261   : > { %2915 = vmatprep.mubr.bf16.mxu1 %v3088_v3  ;;  %v1279_v45 = vpop.permute.xlu0 %1278 }
 0x263   : > { %v3853_v2 = vpop.permute.xlu1 %1363 }
 0x265   : > { %v3856_v20 = vpop.permute.xlu0 %1368 }
 0x267   : > { %v1284_v54 = vpop.permute.xlu1 %1283 }
 0x268   : > { %2916 = vmatmul.mubr.bf16.gmra.mrb[8].mxu1 %v3089_v31 }
 0x269   : > { %2919 = vmatprep.mubr.bf16.mxu1 %v3090_v4  ;;  %v1289_v62 = vpop.permute.xlu0 %1288 }
 0x26b   : > { %v3860_v24 = vpop.permute.xlu1 %1373 }
 0x26f   : > { %v1294_v31 = vpop.permute.xlu1 %1293 }
 0x270   : > { %2920 = vmatmul.mubr.bf16.gmra.mrb[12].mxu1 %v3091_v32 }
 0x271   : > { %2923 = vmatprep.mubr.bf16.mxu1 %v3092_v26 }
 0x278   : > { %2924 = vmatmul.mubr.bf16.gmra.mrb[16].mxu1 %v3093_v5 }
 0x279   : > { %2927 = vmatprep.mubr.bf16.mxu1 %v3094_v42 }
 0x280   : > { %2928 = vmatmul.mubr.bf16.gmra.mrb[20].mxu1 %v3095_v6 }
 0x281   : > { %2931 = vmatprep.mubr.bf16.mxu1 %v3096_v7 }
 0x288   : > { %2932 = vmatmul.mubr.bf16.gmra.mrb[24].mxu1 %v3097_v9  ;;  %v3866_v9 = vpop.permute.xlu0 %1378 }
 0x289   : > { %2935 = vmatprep.mubr.bf16.mxu1 %v3098_v15 }
 0x290   : > { %2936 = vmatmul.mubr.bf16.gmra.mrb[28].mxu1 %v3099_v18 }
 0x32b   : > { %v2909_v52 = vpop.f32.mrb[0].mxu1 }
 0x32c   : > { %v1525_v53 = vadd.f32 %v2909_v52, %v1239_v37  ;;  %v1516_v50 = vpop.f32.mrb[1].mxu1 }
 0x32d   : > { %v1517_v48 = vadd.f32 %v1516_v50, %v1229_v12  ;;  %v2910_v55 = vpop.f32.mrb[2].mxu1 }
 0x32e   : > { %v1645_v10 = vmax.f32 %v1525_v53, 0.0  ;;  %v1528_v11 = vadd.f32 %v2910_v55, %v1244_v38  ;;  %v1519_v16 = vpop.f32.mrb[3].mxu1 }
 0x32f   : > { %v1643_v17 = vmax.f32 %v1517_v48, 0.0  ;;  %v1520_v23 = vadd.f32 %v1519_v16, %v3801_v28 }
 0x330   : > { %v1714_v13 = vsel %vm1707_vm1, %v1645_v10, -inf  ;;  %v1646_v14 = vmax.f32 %v1528_v11, 0.0 }
 0x331   : > { %1715 = vmax.xlane.f32.xlu1 %v1714_v13  ;;  %v1708_v29 = vsel %vm1707_vm1, %v1643_v17, -inf  ;;  %v1644_v56 = vmax.f32 %v1520_v23, 0.0 }
 0x332   : > { %1709 = vmax.xlane.f32.xlu0 %v1708_v29  ;;  %v1717_v59 = vsel %vm1707_vm1, %v1646_v14, -inf }
 0x333   : > { %v2913_v21 = vpop.f32.mrb[4].mxu1  ;;  %v1711_v26 = vsel %vm1707_vm1, %v1644_v56, -inf }
 0x334   : > { %v1541_v25 = vadd.f32 %v2913_v21, %v1259_v1  ;;  %v1532_v27 = vpop.f32.mrb[5].mxu1 }
 0x335   : > { %v1533_v57 = vadd.f32 %v1532_v27, %v1249_v39  ;;  %v2914_v58 = vpop.f32.mrb[6].mxu1  ;;  %v3869_v39 = vpop.permute.xlu1 %1383 }
 0x336   : > { %v1649_v22 = vmax.f32 %v1541_v25, 0.0  ;;  %v1544_v60 = vadd.f32 %v2914_v58, %v1264_v44  ;;  %v1535_v61 = vpop.f32.mrb[7].mxu1  ;;  %1718 = vmax.xlane.f32.xlu0 %v1717_v59 }
 0x337   : > { %v1647_v63 = vmax.f32 %v1533_v57, 0.0  ;;  %v1536_v32 = vadd.f32 %v1535_v61, %v1254_v40 }
 0x338   : > { %v1726_v3 = vsel %vm1707_vm1, %v1649_v22, -inf  ;;  %v1650_v4 = vmax.f32 %v1544_v60, 0.0 }
 0x339   : > { %1727 = vmax.xlane.f32.xlu1 %v1726_v3  ;;  %v1720_v7 = vsel %vm1707_vm1, %v1647_v63, -inf  ;;  %v1648_v15 = vmax.f32 %v1536_v32, 0.0 }
 0x33a   : > { %1712 = vmax.xlane.f32.xlu0 %v1711_v26  ;;  %v1729_v28 = vsel %vm1707_vm1, %v1650_v4, -inf }
 0x33b   : > { %v2917_v5 = vpop.f32.mrb[8].mxu1  ;;  %v1723_v52 = vsel %vm1707_vm1, %v1648_v15, -inf }
 0x33c   : > { %v1557_v42 = vadd.f32 %v2917_v5, %v1279_v45  ;;  %v1548_v6 = vpop.f32.mrb[9].mxu1 }
 0x33d   : > { %v1549_v18 = vadd.f32 %v1548_v6, %v1269_v34  ;;  %v2918_v12 = vpop.f32.mrb[10].mxu1  ;;  %1721 = vmax.xlane.f32.xlu1 %v1720_v7  ;;  %v1299_v34 = vpop.permute.xlu0 %1298 }
 0x33e   : > { %v1653_v30 = vmax.f32 %v1557_v42, 0.0  ;;  %v1560_v37 = vadd.f32 %v2918_v12, %v1284_v54  ;;  %v1551_v38 = vpop.f32.mrb[11].mxu1  ;;  %1730 = vmax.xlane.f32.xlu0 %v1729_v28  ;;  %v1304_v54 = vpop.permute.xlu1 %1303 }
 0x33f   : > { %v1651_v40 = vmax.f32 %v1549_v18, 0.0  ;;  %v1552_v45 = vadd.f32 %v1551_v38, %v1274_v46 }
 0x340   : > { %v1738_v1 = vsel %vm1707_vm1, %v1653_v30, -inf  ;;  %v1654_v44 = vmax.f32 %v1560_v37, 0.0 }
 0x341   : > { %1739 = vmax.xlane.f32.xlu1 %v1738_v1  ;;  %v1732_v55 = vsel %vm1707_vm1, %v1651_v40, -inf  ;;  %v1652_v10 = vmax.f32 %v1552_v45, 0.0 }
 0x342   : > { %1724 = vmax.xlane.f32.xlu0 %v1723_v52  ;;  %v1741_v17 = vsel %vm1707_vm1, %v1654_v44, -inf }
 0x343   : > { %v2921_v53 = vpop.f32.mrb[12].mxu1  ;;  %v1735_v56 = vsel %vm1707_vm1, %v1652_v10, -inf }
 0x344   : > { %v1573_v50 = vadd.f32 %v2921_v53, %v1299_v34  ;;  %v1564_v48 = vpop.f32.mrb[13].mxu1 }
 0x345   : > { %v1565_v11 = vadd.f32 %v1564_v48, %v1289_v62  ;;  %v2922_v16 = vpop.f32.mrb[14].mxu1  ;;  %1733 = vmax.xlane.f32.xlu1 %v1732_v55 }
 0x346   : > { %v1657_v13 = vmax.f32 %v1573_v50, 0.0  ;;  %v1576_v14 = vadd.f32 %v2922_v16, %v1304_v54  ;;  %v1567_v46 = vpop.f32.mrb[15].mxu1  ;;  %1742 = vmax.xlane.f32.xlu0 %v1741_v17 }
 0x347   : > { %v1568_v23 = vadd.f32 %v1567_v46, %v1294_v31  ;;  %v1655_v29 = vmax.f32 %v1565_v11, 0.0 }
 0x348   : > { %v1658_v21 = vmax.f32 %v1576_v14, 0.0  ;;  %v1750_v25 = vsel %vm1707_vm1, %v1657_v13, -inf }
 0x349   : > { %v1656_v27 = vmax.f32 %v1568_v23, 0.0  ;;  %1751 = vmax.xlane.f32.xlu1 %v1750_v25  ;;  %v1744_v60 = vsel %vm1707_vm1, %v1655_v29, -inf }
 0x34a   : > { %1736 = vmax.xlane.f32.xlu0 %v1735_v56  ;;  %v3878_v57 = vsel %vm1707_vm1, %v1658_v21, -inf }
 0x34b   : > { %v2925_v58 = vpop.f32.mrb[16].mxu1  ;;  %v1747_v63 = vsel %vm1707_vm1, %v1656_v27, -inf }
 0x34c   : > { %v1589_v59 = vadd.f32 %v2925_v58, %v3835_v33  ;;  %v1580_v22 = vpop.f32.mrb[17].mxu1 }
 0x34d   : > { %v1581_v61 = vadd.f32 %v1580_v22, %v3797_v47  ;;  %v2926_v62 = vpop.f32.mrb[18].mxu1  ;;  %1745 = vmax.xlane.f32.xlu1 %v1744_v60 }
 0x34e   : > { %v1661_v3 = vmax.f32 %v1589_v59, 0.0  ;;  %v1592_v31 = vadd.f32 %v2926_v62, %v3837_v35  ;;  %v1583_v4 = vpop.f32.mrb[19].mxu1  ;;  %1748 = vmax.xlane.f32.xlu0 %v1747_v63 }
 0x34f   : > { %v1659_v32 = vmax.f32 %v1581_v61, 0.0  ;;  %v1584_v26 = vadd.f32 %v1583_v4, %v3799_v0  ;;  %v1677_v61 = vld [vmem:[#allocation2 + $0x10] sm:$0xff]  ;;  %v1678_v4 = vld [vmem:[#allocation2 + $0x18] sm:$0xff] }
 0x350   : > { %v1762_v5 = vsel %vm1707_vm1, %v1661_v3, -inf  ;;  %v1662_v33 = vmax.f32 %v1592_v31, 0.0 }
 0x351   : > { %v1660_v42 = vmax.f32 %v1584_v26, 0.0  ;;  %1763 = vmax.xlane.f32.xlu1 %v1762_v5  ;;  %v1756_v6 = vsel %vm1707_vm1, %v1659_v32, -inf  ;;  %v1681_v5 = vld [vmem:[#allocation2 + $0x30] sm:$0xff] }
 0x352   : > { %1757 = vmax.xlane.f32.xlu0 %v1756_v6  ;;  %v1765_v0 = vsel %vm1707_vm1, %v1662_v33, -inf  ;;  %v1676_v33 = vld [vmem:[#allocation2 + $0x8] sm:$0xff] }
 0x353   : > { %v2929_v47 = vpop.f32.mrb[20].mxu1  ;;  %v1759_v7 = vsel %vm1707_vm1, %v1660_v42, -inf }
 0x354   : > { %v1605_v15 = vadd.f32 %v2929_v47, %v3843_v19  ;;  %v1596_v18 = vpop.f32.mrb[21].mxu1 }
 0x355   : > { %v1597_v35 = vadd.f32 %v1596_v18, %v3839_v41  ;;  %v2930_v12 = vpop.f32.mrb[22].mxu1  ;;  %1760 = vmax.xlane.f32.xlu1 %v1759_v7  ;;  %v1679_v7 = vld [vmem:[#allocation2 + $0x20] sm:$0xff] }
 0x356   : > { %v1665_v28 = vmax.f32 %v1605_v15, 0.0  ;;  %v1608_v30 = vadd.f32 %v2930_v12, %v3845_v43  ;;  %v1599_v37 = vpop.f32.mrb[23].mxu1  ;;  %1766 = vmax.xlane.f32.xlu0 %v1765_v0  ;;  %v1682_v15 = vld [vmem:[#allocation2 + $0x38] sm:$0xff] }
 0x357   : > { %v1600_v38 = vadd.f32 %v1599_v37, %v3841_v36  ;;  %v1663_v40 = vmax.f32 %v1597_v35, 0.0 }
 0x358   : > { %v1666_v1 = vmax.f32 %v1608_v30, 0.0  ;;  %v1774_v44 = vsel %vm1707_vm1, %v1665_v28, -inf  ;;  %v1685_v28 = vld [vmem:[#allocation2 + $0x50] sm:$0xff]  ;;  %v1680_v30 = vld [vmem:[#allocation2 + $0x28] sm:$0xff] }
 0x359   : > { %1775 = vmax.xlane.f32.xlu1 %v1774_v44  ;;  %v1664_v19 = vmax.f32 %v1600_v38, 0.0  ;;  %v1768_v53 = vsel %vm1707_vm1, %v1663_v40, -inf }
 0x35a   : > { %v1777_v45 = vsel %vm1707_vm1, %v1666_v1, -inf }
 0x35b   : > { %v2933_v41 = vpop.f32.mrb[24].mxu1  ;;  %1778 = vmax.xlane.f32.xlu0 %v1777_v45  ;;  %v1771_v54 = vsel %vm1707_vm1, %v1664_v19, -inf }
 0x35c   : > { %v1621_v52 = vadd.f32 %v2933_v41, %v3851_v8  ;;  %v1612_v34 = vpop.f32.mrb[25].mxu1  ;;  %v1683_v41 = vld [vmem:[#allocation2 + $0x40] sm:$0xff] }
 0x35d   : > { %v1613_v43 = vadd.f32 %v1612_v34, %v3847_v49  ;;  %v2934_v50 = vpop.f32.mrb[26].mxu1  ;;  %1769 = vmax.xlane.f32.xlu1 %v1768_v53  ;;  %v1686_v34 = vld [vmem:[#allocation2 + $0x58] sm:$0xff] }
 0x35e   : > { %v1669_v36 = vmax.f32 %v1621_v52, 0.0  ;;  %v1624_v48 = vadd.f32 %v2934_v50, %v3853_v2  ;;  %v1615_v55 = vpop.f32.mrb[27].mxu1 }
 0x35f   : > { %v1616_v10 = vadd.f32 %v1615_v55, %v3849_v51  ;;  %1772 = vmax.xlane.f32.xlu0 %v1771_v54  ;;  %v1667_v11 = vmax.f32 %v1613_v43, 0.0  ;;  %v1689_v54 = vld [vmem:[#allocation2 + $0x70] sm:$0xff] }
 0x360   : > { %v1670_v16 = vmax.f32 %v1624_v48, 0.0  ;;  %v1786_v8 = vsel %vm1707_vm1, %v1669_v36, -inf }
 0x361   : > { %1787 = vmax.xlane.f32.xlu1 %v1786_v8  ;;  %v1668_v17 = vmax.f32 %v1616_v10, 0.0  ;;  %v1780_v2 = vsel %vm1707_vm1, %v1667_v11, -inf }
 0x362   : > { %v1789_v13 = vsel %vm1707_vm1, %v1670_v16, -inf  ;;  %v1684_v16 = vld [vmem:[#allocation2 + $0x48] sm:$0xff] }
 0x363   : > { %v2937_v49 = vpop.f32.mrb[28].mxu1  ;;  %1790 = vmax.xlane.f32.xlu0 %v1789_v13  ;;  %v1783_v27 = vsel %vm1707_vm1, %v1668_v17, -inf }
 0x364   : > { %v1637_v14 = vadd.f32 %v2937_v49, %v3866_v9  ;;  %v1628_v46 = vpop.f32.mrb[29].mxu1 }
 0x365   : > { %v1629_v23 = vadd.f32 %v1628_v46, %v3856_v20  ;;  %v2938_v29 = vpop.f32.mrb[30].mxu1  ;;  %1781 = vmax.xlane.f32.xlu1 %v1780_v2  ;;  %v1688_v2 = vld [vmem:[#allocation2 + $0x68] sm:$0xff] }
 0x366   : > { %v1673_v51 = vmax.f32 %v1637_v14, 0.0  ;;  %v1640_v21 = vadd.f32 %v2938_v29, %v3869_v39  ;;  %v1631_v25 = vpop.f32.mrb[31].mxu1  ;;  %v1687_v14 = vld [vmem:[#allocation2 + $0x60] sm:$0xff] }
 0x367   : > { %v1632_v56 = vadd.f32 %v1631_v25, %v3860_v24  ;;  %1784 = vmax.xlane.f32.xlu0 %v1783_v27  ;;  %v1671_v58 = vmax.f32 %v1629_v23, 0.0  ;;  %v1675_v24 = vld [vmem:[#allocation2] sm:$0xff] }
 0x368   : > { %v1674_v59 = vmax.f32 %v1640_v21, 0.0  ;;  %v1798_v9 = vsel %vm1707_vm1, %v1673_v51, -inf }
 0x369   : > { %1799 = vmax.xlane.f32.xlu1 %v1798_v9  ;;  %v1672_v22 = vmax.f32 %v1632_v56, 0.0  ;;  %v1792_v20 = vsel %vm1707_vm1, %v1671_v58, -inf  ;;  %v1693_v56 = vld [vmem:[#allocation2 + $0x90] sm:$0xff]  ;;  %v1691_v9 = vld [vmem:[#allocation2 + $0x80] sm:$0xff] }
 0x36a   : > { %v1801_v60 = vsel %vm1707_vm1, %v1674_v59, -inf }
 0x36b   : > { %1802 = vmax.xlane.f32.xlu0 %v1801_v60  ;;  %v1795_v39 = vsel %vm1707_vm1, %v1672_v22, -inf  ;;  %vm3218_vm1 = vmmov 0  }
 0x36d   : > { %1793 = vmax.xlane.f32.xlu1 %v1792_v20 }
 0x36f   : > { %1796 = vmax.xlane.f32.xlu0 %v1795_v39 }
 0x373   : > { %1754 = vmax.xlane.f32.xlu0 %v3878_v57 }
 0x3be   : > { %v1716_v62 = vpop.xlane.xlu1 %1715 }
 0x3bf   : > { %v1806_v63 = vmax.f32 %v1677_v61, %v1716_v62  ;;  %v1710_v3 = vpop.xlane.xlu0 %1709  ;;  %v1692_v61 = vld [vmem:[#allocation2 + $0x88] sm:$0xff]  ;;  %v1694_v62 = vld [vmem:[#allocation2 + $0x98] sm:$0xff] }
 0x3c0   : > { %v1804_v31 = vmax.f32 %v1675_v24, %v1710_v3 }
 0x3c1   : > { %1839 = vst.msk [vmem:[#allocation2 + $0x10] sm:$0xff] %vm410_vm0, %v1806_v63 }
 0x3c2   : > { %1837 = vst.msk [vmem:[#allocation2] sm:$0xff] %vm410_vm0, %v1804_v31 }
 0x3c3   : > { %v1719_v32 = vpop.xlane.xlu0 %1718 }
 0x3c4   : > { %v1807_v26 = vmax.f32 %v1678_v4, %v1719_v32 }
 0x3c6   : > { %1840 = vst.msk [vmem:[#allocation2 + $0x18] sm:$0xff] %vm410_vm0, %v1807_v26  ;;  %v1728_v42 = vpop.xlane.xlu1 %1727 }
 0x3c7   : > { %v1810_v6 = vmax.f32 %v1681_v5, %v1728_v42  ;;  %v1713_v57 = vpop.xlane.xlu0 %1712  ;;  %v1697_v5 = vld [vmem:[#allocation2 + $0xb0] sm:$0xff] }
 0x3c8   : > { %v1805_v47 = vmax.f32 %v1676_v33, %v1713_v57  ;;  %v1874_v37 = vld [vmem:[#allocation2 + $0x10] sm:$0xff]  ;;  %v1698_v57 = vld [vmem:[#allocation2 + $0xb8] sm:$0xff] }
 0x3c9   : > { %1843 = vst.msk [vmem:[#allocation2 + $0x30] sm:$0xff] %vm410_vm0, %v1810_v6  ;;  %v1872_v48 = vld [vmem:[#allocation2] sm:$0xff] }
 0x3ca   : > { %1838 = vst.msk [vmem:[#allocation2 + $0x8] sm:$0xff] %vm410_vm0, %v1805_v47  ;;  %v1722_v18 = vpop.xlane.xlu1 %1721 }
 0x3cb   : > { %v1808_v35 = vmax.f32 %v1679_v7, %v1722_v18  ;;  %v1731_v12 = vpop.xlane.xlu0 %1730 }
 0x3cc   : > { %v1811_v0 = vmax.f32 %v1682_v15, %v1731_v12  ;;  %v1695_v15 = vld [vmem:[#allocation2 + $0xa0] sm:$0xff] }
 0x3cd   : > { %1841 = vst.msk [vmem:[#allocation2 + $0x20] sm:$0xff] %vm410_vm0, %v1808_v35  ;;  %v1875_v38 = vld [vmem:[#allocation2 + $0x18] sm:$0xff] }
 0x3ce   : > { %1844 = vst.msk [vmem:[#allocation2 + $0x38] sm:$0xff] %vm410_vm0, %v1811_v0  ;;  %v1740_v40 = vpop.xlane.xlu1 %1739  ;;  %v1905_v1 = vpack.c.bf16 %v1875_v38, %v1874_v37 }
 0x3cf   : > { %v1814_v44 = vmax.f32 %v1685_v28, %v1740_v40  ;;  %v1725_v19 = vpop.xlane.xlu0 %1724  ;;  %v1696_v28 = vld [vmem:[#allocation2 + $0xa8] sm:$0xff]  ;;  %v1701_v40 = vld [vmem:[#allocation2 + $0xd0] sm:$0xff] }
 0x3d0   : > { %v1809_v45 = vmax.f32 %v1680_v30, %v1725_v19  ;;  %v1971_v52 = vunpack.c.l.b16 %v1905_v1  ;;  %v1972_v10 = vunpack.c.h.b16 %v1905_v1  ;;  %v1878_v25 = vld [vmem:[#allocation2 + $0x30] sm:$0xff] }
 0x3d1   : > { %1847 = vst.msk [vmem:[#allocation2 + $0x50] sm:$0xff] %vm410_vm0, %v1814_v44  ;;  %v1873_v53 = vld [vmem:[#allocation2 + $0x8] sm:$0xff] }
 0x3d2   : > { %1842 = vst.msk [vmem:[#allocation2 + $0x28] sm:$0xff] %vm410_vm0, %v1809_v45  ;;  %v1734_v43 = vpop.xlane.xlu1 %1733  ;;  %2008 = vperm.xlu1 %3074, %v1971_v52   ;;  %v1904_v11 = vpack.c.bf16 %v1873_v53, %v1872_v48  ;;  %v1702_v53 = vld [vmem:[#allocation2 + $0xd8] sm:$0xff]  ;;  %v1699_v48 = vld [vmem:[#allocation2 + $0xc0] sm:$0xff] }
 0x3d3   : > { %v1812_v50 = vmax.f32 %v1683_v41, %v1734_v43  ;;  %v1743_v36 = vpop.xlane.xlu0 %1742 }
 0x3d4   : > { %v1815_v55 = vmax.f32 %v1686_v34, %v1743_v36  ;;  %v1969_v46 = vunpack.c.l.b16 %v1904_v11  ;;  %v1970_v58 = vunpack.c.h.b16 %v1904_v11  ;;  %v1876_v32 = vld [vmem:[#allocation2 + $0x20] sm:$0xff] }
 0x3d5   : > { %1845 = vst.msk [vmem:[#allocation2 + $0x40] sm:$0xff] %vm410_vm0, %v1812_v50  ;;  %v1879_v23 = vld [vmem:[#allocation2 + $0x38] sm:$0xff] }
 0x3d6   : > { %1848 = vst.msk [vmem:[#allocation2 + $0x58] sm:$0xff] %vm410_vm0, %v1815_v55  ;;  %v1752_v8 = vpop.xlane.xlu1 %1751  ;;  %2011 = vperm.xlu1 %3074, %v1972_v10   ;;  %v1907_v59 = vpack.c.bf16 %v1879_v23, %v1878_v25 }
 0x3d7   : > { %v1818_v17 = vmax.f32 %v1689_v54, %v1752_v8  ;;  %v1737_v13 = vpop.xlane.xlu0 %1736 }
 0x3d8   : > { %v1813_v49 = vmax.f32 %v1684_v16, %v1737_v13  ;;  %v1975_v24 = vunpack.c.l.b16 %v1907_v59  ;;  %v1976_v33 = vunpack.c.h.b16 %v1907_v59  ;;  %v1882_v37 = vld [vmem:[#allocation2 + $0x50] sm:$0xff]  ;;  %v1700_v16 = vld [vmem:[#allocation2 + $0xc8] sm:$0xff] }
 0x3d9   : > { %1851 = vst.msk [vmem:[#allocation2 + $0x70] sm:$0xff] %vm410_vm0, %v1818_v17  ;;  %v1877_v63 = vld [vmem:[#allocation2 + $0x28] sm:$0xff] }
 0x3da   : > { %1846 = vst.msk [vmem:[#allocation2 + $0x48] sm:$0xff] %vm410_vm0, %v1813_v49  ;;  %v1746_v29 = vpop.xlane.xlu1 %1745  ;;  %2002 = vperm.xlu1 %3074, %v1969_v46   ;;  %v1906_v42 = vpack.c.bf16 %v1877_v63, %v1876_v32 }
 0x3db   : > { %v1816_v51 = vmax.f32 %v1687_v14, %v1746_v29  ;;  %v1749_v21 = vpop.xlane.xlu0 %1748 }
 0x3dc   : > { %v1817_v27 = vmax.f32 %v1688_v2, %v1749_v21  ;;  %v1973_v18 = vunpack.c.l.b16 %v1906_v42  ;;  %v1974_v1 = vunpack.c.h.b16 %v1906_v42  ;;  %v1880_v14 = vld [vmem:[#allocation2 + $0x40] sm:$0xff]  ;;  %v1705_v2 = vld [vmem:[#allocation2 + $0xf0] sm:$0xff] }
 0x3dd   : > { %1849 = vst.msk [vmem:[#allocation2 + $0x60] sm:$0xff] %vm410_vm0, %v1816_v51  ;;  %v1883_v12 = vld [vmem:[#allocation2 + $0x58] sm:$0xff] }
 0x3de   : > { %1850 = vst.msk [vmem:[#allocation2 + $0x68] sm:$0xff] %vm410_vm0, %v1817_v27  ;;  %v1764_v22 = vpop.xlane.xlu1 %1763  ;;  %2005 = vperm.xlu1 %3074, %v1970_v58   ;;  %v1909_v45 = vpack.c.bf16 %v1883_v12, %v1882_v37  ;;  %v1706_v27 = vld [vmem:[#allocation2 + $0xf8] sm:$0xff]  ;;  %v3100_v37 = vld [vmem:[%s4232_s5 + $0x40] sm:$0xff]  }
 0x3df   : > { %v1822_v60 = vmax.f32 %v1693_v56, %v1764_v22  ;;  %v1758_v20 = vpop.xlane.xlu0 %1757  ;;  %2823 = vmatprep.subr.bf16.mxu0 %v3100_v37 }
 0x3e0   : > { %v1820_v39 = vmax.f32 %v1691_v9, %v1758_v20  ;;  %v1979_v55 = vunpack.c.l.b16 %v1909_v45  ;;  %v1980_v23 = vunpack.c.h.b16 %v1909_v45  ;;  %v1703_v9 = vld [vmem:[#allocation2 + $0xe0] sm:$0xff]  ;;  %v3102_v45 = vld [vmem:[%s4232_s5 + $0x48] sm:$0xff]  }
 0x3e1   : > { %1855 = vst.msk [vmem:[#allocation2 + $0x90] sm:$0xff] %vm410_vm0, %v1822_v60  ;;  %v1881_v10 = vld [vmem:[#allocation2 + $0x48] sm:$0xff] }
 0x3e2   : > { %1853 = vst.msk [vmem:[#allocation2 + $0x80] sm:$0xff] %vm410_vm0, %v1820_v39  ;;  %v1761_v3 = vpop.xlane.xlu1 %1760  ;;  %2020 = vperm.xlu1 %3074, %v1975_v24   ;;  %v1908_v29 = vpack.c.bf16 %v1881_v10, %v1880_v14 }
 0x3e3   : > { %v1821_v31 = vmax.f32 %v1692_v61, %v1761_v3  ;;  %v1767_v4 = vpop.xlane.xlu0 %1766  ;;  %v1704_v3 = vld [vmem:[#allocation2 + $0xe8] sm:$0xff] }
 0x3e4   : > { %v1823_v26 = vmax.f32 %v1694_v62, %v1767_v4  ;;  %v1977_v22 = vunpack.c.l.b16 %v1908_v29  ;;  %v1884_v24 = vld [vmem:[#allocation2 + $0x60] sm:$0xff] }
 0x3e5   : > { %1854 = vst.msk [vmem:[#allocation2 + $0x88] sm:$0xff] %vm410_vm0, %v1821_v31  ;;  %v1885_v62 = vld [vmem:[#allocation2 + $0x68] sm:$0xff] }
 0x3e6   : > { %1856 = vst.msk [vmem:[#allocation2 + $0x98] sm:$0xff] %vm410_vm0, %v1823_v26  ;;  %v1776_v6 = vpop.xlane.xlu1 %1775  ;;  %2023 = vperm.xlu1 %3074, %v1976_v33   ;;  %v1978_v26 = vunpack.c.h.b16 %v1908_v29 }
 0x3e7   : > { %v1826_v47 = vmax.f32 %v1697_v5, %v1776_v6  ;;  %v3949_v5 = vpack.c.bf16 %v1885_v62, %v1884_v24 }
 0x3e8   : > { %v1779_v7 = vpop.xlane.xlu0 %1778 }
 0x3e9   : > { %1859 = vst.msk [vmem:[#allocation2 + $0xb0] sm:$0xff] %vm410_vm0, %v1826_v47  ;;  %v1827_v35 = vmax.f32 %v1698_v57, %v1779_v7  ;;  %v1888_v44 = vld [vmem:[#allocation2 + $0x80] sm:$0xff]  ;;  %v1690_v7 = vld [vmem:[#allocation2 + $0x78] sm:$0xff] }
 0x3ea   : > { %v1770_v0 = vpop.xlane.xlu1 %1769  ;;  %2014 = vperm.xlu1 %3074, %v1973_v18  }
 0x3eb   : > { %1860 = vst.msk [vmem:[#allocation2 + $0xb8] sm:$0xff] %vm410_vm0, %v1827_v35  ;;  %v1824_v30 = vmax.f32 %v1695_v15, %v1770_v0  ;;  %v1890_v15 = vld [vmem:[#allocation2 + $0x90] sm:$0xff]  ;;  %v1981_v35 = vunpack.c.l.b16 %v3949_v5 }
 0x3ec   : > { %v1773_v38 = vpop.xlane.xlu0 %1772  ;;  %v1889_v19 = vld [vmem:[#allocation2 + $0x88] sm:$0xff] }
 0x3ed   : > { %1857 = vst.msk [vmem:[#allocation2 + $0xa0] sm:$0xff] %vm410_vm0, %v1824_v30  ;;  %v1825_v41 = vmax.f32 %v1696_v28, %v1773_v38  ;;  %v3937_v52 = vpack.c.bf16 %v1889_v19, %v1888_v44  ;;  %v1891_v47 = vld [vmem:[#allocation2 + $0x98] sm:$0xff] }
 0x3ee   : > { %v1788_v34 = vpop.xlane.xlu1 %1787  ;;  %2017 = vperm.xlu1 %3074, %v1974_v1   ;;  %v1913_v12 = vpack.c.bf16 %v1891_v47, %v1890_v15  ;;  %v3101_v1 = vld [vmem:[%s4232_s5] sm:$0xff]  }
 0x3ef   : > { %1858 = vst.msk [vmem:[#allocation2 + $0xa8] sm:$0xff] %vm410_vm0, %v1825_v41  ;;  %v1830_v43 = vmax.f32 %v1701_v40, %v1788_v34  ;;  %v1986_v50 = vunpack.c.h.b16 %v3937_v52  ;;  %2824 = vmatpush3.bf16.msra.mxu0 %v3101_v1  ;;  %v3103_v41 = vld [vmem:[%s4232_s5 + $0x8] sm:$0xff]  }
 0x3f0   : > { %v1791_v36 = vpop.xlane.xlu0 %1790  ;;  %v1894_v8 = vld [vmem:[#allocation2 + $0xb0] sm:$0xff]  ;;  %v1987_v38 = vunpack.c.l.b16 %v1913_v12  ;;  %v1988_v34 = vunpack.c.h.b16 %v1913_v12  ;;  %2825 = vmatprep.subr.bf16.mxu0 %v3102_v45 }
 0x3f1   : > { %1863 = vst.msk [vmem:[#allocation2 + $0xd0] sm:$0xff] %vm410_vm0, %v1830_v43  ;;  %v1831_v54 = vmax.f32 %v1702_v53, %v1791_v36  ;;  %2053 = vperm.xlu0 %3075, %v1986_v50   ;;  %v3104_v50 = vld [vmem:[%s4232_s5 + $0x50] sm:$0xff]  }
 0x3f2   : > { %v1782_v11 = vpop.xlane.xlu1 %1781  ;;  %2032 = vperm.xlu1 %3074, %v1979_v55   ;;  %v1895_v17 = vld [vmem:[#allocation2 + $0xb8] sm:$0xff]  ;;  %v3105_v36 = vld [vmem:[%s4232_s5 + $0x10] sm:$0xff]  }
 0x3f3   : > { %1864 = vst.msk [vmem:[#allocation2 + $0xd8] sm:$0xff] %vm410_vm0, %v1831_v54  ;;  %v1828_v13 = vmax.f32 %v1699_v48, %v1782_v11  ;;  %v1915_v49 = vpack.c.bf16 %v1895_v17, %v1894_v8  ;;  %2826 = vmatpush3.bf16.msra.mxu0 %v3103_v41  ;;  %v1985_v48 = vunpack.c.l.b16 %v3937_v52 }
 0x3f4   : > { %v1785_v46 = vpop.xlane.xlu0 %1784  ;;  %v1892_v60 = vld [vmem:[#allocation2 + $0xa0] sm:$0xff]  ;;  %2827 = vmatprep.subr.bf16.mxu0 %v3104_v50 }
 0x3f5   : > { %1861 = vst.msk [vmem:[#allocation2 + $0xc0] sm:$0xff] %vm410_vm0, %v1828_v13  ;;  %v1829_v51 = vmax.f32 %v1700_v16, %v1785_v46  ;;  %v1991_v21 = vunpack.c.l.b16 %v1915_v49  ;;  %v1992_v39 = vunpack.c.h.b16 %v1915_v49  ;;  %v3106_v16 = vld [vmem:[%s4232_s5 + $0x58] sm:$0xff]   ;;  %v1886_v46 = vld [vmem:[#allocation2 + $0x70] sm:$0xff] }
 0x3f6   : > { %v1800_v25 = vpop.xlane.xlu1 %1799  ;;  %2035 = vperm.xlu1 %3074, %v1980_v23   ;;  %v1893_v56 = vld [vmem:[#allocation2 + $0xa8] sm:$0xff]  ;;  %v1982_v23 = vunpack.c.h.b16 %v3949_v5 }
 0x3f7   : > { %1862 = vst.msk [vmem:[#allocation2 + $0xc8] sm:$0xff] %vm410_vm0, %v1829_v51  ;;  %v1834_v58 = vmax.f32 %v1705_v2, %v1800_v25  ;;  %2068 = vperm.xlu0 %3075, %v1991_v21   ;;  %v3946_v61 = vpack.c.bf16 %v1893_v56, %v1892_v60  ;;  %2828 = vmatpush3.bf16.msra.mxu0 %v3105_v36  ;;  %v3107_v13 = vld [vmem:[%s4232_s5 + $0x18] sm:$0xff]   ;;  %v3108_v2 = vld [vmem:[%s4232_s5 + $0x60] sm:$0xff]   ;;  %v3110_v25 = vld [vmem:[%s4232_s5 + $0x68] sm:$0xff]  }
 0x3f8   : > { %v1803_v59 = vpop.xlane.xlu0 %1802  ;;  %v1898_v33 = vld [vmem:[#allocation2 + $0xd0] sm:$0xff]  ;;  %2829 = vmatprep.subr.bf16.mxu0 %v3106_v16  ;;  %v3111_v56 = vld [vmem:[%s4232_s5 + $0x28] sm:$0xff]  }
 0x3f9   : > { %1867 = vst.msk [vmem:[#allocation2 + $0xf0] sm:$0xff] %vm410_vm0, %v1834_v58  ;;  %v1835_v20 = vmax.f32 %v1706_v27, %v1803_v59  ;;  %v1990_v6 = vunpack.c.h.b16 %v3946_v61  ;;  %v1989_v8 = vunpack.c.l.b16 %v3946_v61  ;;  %v3109_v51 = vld [vmem:[%s4232_s5 + $0x20] sm:$0xff]   ;;  %v3112_v59 = vld [vmem:[%s4232_s5 + $0x70] sm:$0xff]   ;;  %v3217_v61 = vmov 0.0  }
 0x3fa   : > { %v1794_v63 = vpop.xlane.xlu1 %1793  ;;  %2026 = vperm.xlu1 %3074, %v1977_v22   ;;  %v1899_v31 = vld [vmem:[#allocation2 + $0xd8] sm:$0xff]  ;;  %v3113_v22 = vld [vmem:[%s4232_s5 + $0x30] sm:$0xff]   ;;  %2959 = vmatprep.subr.bf16.mxu1 %v3217_v61 }
 0x3fb   : > { %1868 = vst.msk [vmem:[#allocation2 + $0xf8] sm:$0xff] %vm410_vm0, %v1835_v20  ;;  %v1832_v4 = vmax.f32 %v1703_v9, %v1794_v63  ;;  %2071 = vperm.xlu0 %3075, %v1992_v39   ;;  %v1917_v57 = vpack.c.bf16 %v1899_v31, %v1898_v33  ;;  %2830 = vmatpush3.bf16.msra.mxu0 %v3107_v13  ;;  %v3114_v20 = vld [vmem:[%s4232_s5 + $0x78] sm:$0xff]   ;;  %v2097_v33 = vlaneseq }
 0x3fc   : > { %v1797_v32 = vpop.xlane.xlu0 %1796  ;;  %v1896_v40 = vld [vmem:[#allocation2 + $0xc0] sm:$0xff]  ;;  %2831 = vmatprep.subr.bf16.mxu0 %v3108_v2  ;;  %v3115_v39 = vld [vmem:[%s4232_s5 + $0x38] sm:$0xff]   ;;  %2967 = vmatprep.mubr.msk.bf16.mxu1 %vm3218_vm1, %v3217_v61 }
 0x3fd   : > { %1865 = vst.msk [vmem:[#allocation2 + $0xe0] sm:$0xff] %vm410_vm0, %v1832_v4  ;;  %v1833_v42 = vmax.f32 %v1704_v3, %v1797_v32  ;;  %v1995_v28 = vunpack.c.l.b16 %v1917_v57  ;;  %v1996_v44 = vunpack.c.h.b16 %v1917_v57  ;;  %v4019_v57 = vand.u32 127, %v2097_v33 }
 0x3fe   : > { %2029 = vperm.xlu1 %3074, %v1978_v26   ;;  %v1897_v30 = vld [vmem:[#allocation2 + $0xc8] sm:$0xff] }
 0x3ff   : > { %1866 = vst.msk [vmem:[#allocation2 + $0xe8] sm:$0xff] %vm410_vm0, %v1833_v42  ;;  %2065 = vperm.xlu0 %3075, %v1990_v6   ;;  %v1916_v19 = vpack.c.bf16 %v1897_v30, %v1896_v40  ;;  %2832 = vmatpush3.bf16.msra.mxu0 %v3109_v51  ;;  %v2117_v40 = vadd.s32 4294967272, %v4019_v57  ;;  %v2145_v16 = vadd.s32 4294967240, %v4019_v57 }
 0x400   : > { %v1755_v18 = vpop.xlane.xlu0 %1754  ;;  %v1902_v55 = vld [vmem:[#allocation2 + $0xf0] sm:$0xff]  ;;  %2833 = vmatprep.subr.bf16.mxu0 %v3110_v25 }
 0x401   : > { %v1819_v0 = vmax.f32 %v1690_v7, %v1755_v18  ;;  %v1993_v53 = vunpack.c.l.b16 %v1916_v19  ;;  %v1994_v54 = vunpack.c.h.b16 %v1916_v19  ;;  %v2103_v7 = vadd.s32 4294967288, %v4019_v57 }
 0x402   : > { %2038 = vperm.xlu1 %3074, %v1981_v35   ;;  %v1903_v43 = vld [vmem:[#allocation2 + $0xf8] sm:$0xff]  ;;  %v4026_v18 = vshrl.u32 %v2097_v33, 7 }
 0x403   : > { %1852 = vst.msk [vmem:[#allocation2 + $0x78] sm:$0xff] %vm410_vm0, %v1819_v0  ;;  %2080 = vperm.xlu0 %3075, %v1995_v28   ;;  %v1919_v10 = vpack.c.bf16 %v1903_v43, %v1902_v55  ;;  %2834 = vmatpush3.bf16.msra.mxu0 %v3111_v56  ;;  %v2110_v0 = vadd.s32 4294967280, %v4019_v57  ;;  %v2138_v55 = vadd.s32 4294967248, %v4019_v57  ;;  %vm2206_vm0 = vcmask 1048512  }
 0x404   : > { %v1900_v17 = vld [vmem:[#allocation2 + $0xe0] sm:$0xff]  ;;  %2835 = vmatprep.subr.bf16.mxu0 %v3112_v59  ;;  %v2106_v12 = vsub.s32 %v2103_v7, %v4026_v18  ;;  %v2101_v30 = vsub.s32 %v4019_v57, %v4026_v18  ;;  %v2120_v43 = vsub.s32 %v2117_v40, %v4026_v18  ;;  %v2173_v59 = vadd.s32 4294967208, %v4019_v57 }
 0x405   : > { %v1999_v52 = vunpack.c.l.b16 %v1919_v10  ;;  %v2000_v60 = vunpack.c.h.b16 %v1919_v10  ;;  %v2113_v19 = vsub.s32 %v2110_v0, %v4026_v18 }
 0x406   : > { %2056 = vperm.xlu1 %3074, %v1987_v38   ;;  %v1901_v11 = vld [vmem:[#allocation2 + $0xe8] sm:$0xff]  ;;  %v2124_v38 = vadd.s32 4294967264, %v4019_v57 }
 0x407   : > { %2083 = vperm.xlu0 %3075, %v1996_v44   ;;  %v1918_v49 = vpack.c.bf16 %v1901_v11, %v1900_v17  ;;  %2836 = vmatpush3.bf16.msra.mxu0 %v3113_v22  ;;  %v2131_v44 = vadd.s32 4294967256, %v4019_v57  ;;  %v2152_v17 = vadd.s32 4294967232, %v4019_v57 }
 0x408   : > { %2837 = vmatprep.subr.bf16.mxu0 %v3114_v20 }
 0x409   : > { %v1997_v21 = vunpack.c.l.b16 %v1918_v49  ;;  %v1998_v58 = vunpack.c.h.b16 %v1918_v49  ;;  %v4052_v36 = vsub.s32 %v2131_v44, %v4026_v18  ;;  %v2159_v49 = vadd.s32 4294967224, %v4019_v57 }
 0x40a   : > { %2059 = vperm.xlu1 %3074, %v1988_v34   ;;  %v1887_v14 = vld [vmem:[#allocation2 + $0x78] sm:$0xff]  ;;  %v2155_v51 = vsub.s32 %v2152_v17, %v4026_v18 }
 0x40b   : > { %2074 = vperm.xlu0 %3075, %v1993_v53   ;;  %v1911_v29 = vpack.c.bf16 %v1887_v14, %v1886_v46  ;;  %2838 = vmatpush3.bf16.msra.mxu0 %v3115_v39  ;;  %v4047_v53 = vsub.s32 %v2124_v38, %v4026_v18  ;;  %v2141_v14 = vsub.s32 %v2138_v55, %v4026_v18 }
 0x40c   : > { %2939 = vmatprep.subr.bf16.mxu0 %v3217_v61 }
 0x40d   : > { %v1983_v27 = vunpack.c.l.b16 %v1911_v29  ;;  %v1984_v9 = vunpack.c.h.b16 %v1911_v29 }
 0x40e   : > { %2050 = vperm.xlu1 %3074, %v1985_v48  }
 0x40f   : > { %2077 = vperm.xlu0 %3075, %v1994_v54  }
 0x412   : > { %2062 = vperm.xlu1 %3074, %v1989_v8  }
 0x413   : > { %2092 = vperm.xlu0 %3075, %v1999_v52  }
 0x416   : > { %2041 = vperm.xlu1 %3074, %v1982_v23  }
 0x417   : > { %2086 = vperm.xlu0 %3075, %v1997_v21   ;;  %v2148_v21 = vsub.s32 %v2145_v16, %v4026_v18 }
 0x41a   : > { %2044 = vperm.xlu1 %3074, %v1983_v27   ;;  %v2162_v27 = vsub.s32 %v2159_v49, %v4026_v18 }
 0x41b   : > { %2089 = vperm.xlu0 %3075, %v1998_v58   ;;  %v2166_v58 = vadd.s32 4294967216, %v4019_v57 }
 0x41d   : > { %v2169_v33 = vsub.s32 %v2166_v58, %v4026_v18 }
 0x41e   : > { %2047 = vperm.xlu1 %3074, %v1984_v9  }
 0x41f   : > { %2095 = vperm.xlu0 %3075, %v2000_v60  }
 0x451   : > { %v2009_v24 = vpop.permute.xlu1 %2008 }
 0x452   : > { %v2114_v48 = vrot.slane %v2009_v24, %v2113_v19 }
 0x455   : > { %v2012_v62 = vpop.permute.xlu1 %2011 }
 0x456   : > { %v2121_v13 = vrot.slane %v2012_v62, %v2120_v43  ;;  %v2180_v62 = vadd.s32 4294967200, %v4019_v57 }
 0x459   : > { %v2003_v63 = vpop.permute.xlu1 %2002 }
 0x45a   : > { %v2102_v41 = vrot.slane %v2003_v63, %v2101_v30 }
 0x45d   : > { %v2006_v3 = vpop.permute.xlu1 %2005 }
 0x45e   : > { %v2107_v1 = vrot.slane %v2006_v3, %v2106_v12 }
 0x460   : > { %v2109_v50 = vsel %vm2108_vm2, %v2107_v1, %v2102_v41  ;;  %v2183_v1 = vsub.s32 %v2180_v62, %v4026_v18 }
 0x461   : > { %v4009_v31 = vpop.permute.xlu1 %2020  ;;  %v2116_v11 = vsel %vm2115_vm3, %v2114_v48, %v2109_v50 }
 0x462   : > { %v2123_v2 = vsel %vm2122_vm4, %v2121_v13, %v2116_v11  ;;  %v2142_v56 = vrot.slane %v4009_v31, %v2141_v14 }
 0x465   : > { %v4011_v4 = vpop.permute.xlu1 %2023 }
 0x466   : > { %v2149_v3 = vrot.slane %v4011_v4, %v2148_v21 }
 0x469   : > { %v2015_v32 = vpop.permute.xlu1 %2014 }
 0x46a   : > { %v2128_v8 = vrot.slane %v2015_v32, %v4047_v53 }
 0x46c   : > { %v2130_v29 = vsel %vm2129_vm5, %v2128_v8, %v2123_v2 }
 0x46d   : > { %v2018_v26 = vpop.permute.xlu1 %2017 }
 0x46e   : > { %v2135_v52 = vrot.slane %v2018_v26, %v4052_v36 }
 0x470   : > { %v4015_v42 = vpop.permute.xlu0 %2053  ;;  %v2137_v25 = vsel %vm2136_vm6, %v2135_v52, %v2130_v29 }
 0x471   : > { %v4013_v5 = vpop.permute.xlu1 %2032  ;;  %v2215_v22 = vrot.slane %v4015_v42, %v2106_v12  ;;  %v2144_v39 = vsel %vm2143_vm7, %v2142_v56, %v2137_v25  ;;  %v2176_v42 = vsub.s32 %v2173_v59, %v4026_v18 }
 0x475   : > { %v4017_v6 = vpop.permute.xlu1 %2035 }
 0x476   : > { %v4021_v47 = vpop.permute.xlu0 %2068 }
 0x477   : > { %v2240_v44 = vrot.slane %v4021_v47, %v2141_v14 }
 0x479   : > { %v4024_v15 = vpop.permute.xlu1 %2026 }
 0x47a   : > { %v4028_v35 = vpop.permute.xlu0 %2071  ;;  %v2156_v24 = vrot.slane %v4024_v15, %v2155_v51  ;;  %v2151_v15 = vsel %vm2150_vm8, %v2149_v3, %v2144_v39 }
 0x47b   : > { %v2245_v50 = vrot.slane %v4028_v35, %v2148_v21  ;;  %v2177_v35 = vrot.slane %v4017_v6, %v2176_v42 }
 0x47c   : > { %v2158_v38 = vsel %vm2157_vm9, %v2156_v24, %v2151_v15  ;;  %v3122_v15 = vld [vmem:[%s4233_s6 + $0x30] sm:$0xff]  }
 0x47d   : > { %v4032_v28 = vpop.permute.xlu1 %2029 }
 0x47e   : > { %v4036_v37 = vpop.permute.xlu0 %2065  ;;  %v2163_v31 = vrot.slane %v4032_v28, %v2162_v27  ;;  %v2187_v28 = vadd.s32 4294967192, %v4019_v57 }
 0x47f   : > { %v2235_v40 = vrot.slane %v4036_v37, %v4052_v36 }
 0x480   : > { %v2190_v47 = vsub.s32 %v2187_v28, %v4026_v18  ;;  %v3126_v28 = vld [vmem:[%s4234_s7 + $0x10] sm:$0xff]  }
 0x481   : > { %v4042_v45 = vpop.permute.xlu1 %2038 }
 0x482   : > { %v4044_v34 = vpop.permute.xlu0 %2080  ;;  %v2184_v49 = vrot.slane %v4042_v45, %v2183_v1 }
 0x483   : > { %v2260_v17 = vrot.slane %v4044_v34, %v2169_v33 }
 0x485   : > { %v2057_v54 = vpop.permute.xlu1 %2056 }
 0x486   : > { %v4055_v10 = vpop.permute.xlu0 %2083  ;;  %v2220_v63 = vrot.slane %v2057_v54, %v2113_v19  ;;  %v2165_v19 = vsel %vm2164_vm10, %v2163_v31, %v2158_v38  ;;  %v2201_v54 = vadd.s32 4294967176, %v4019_v57  ;;  %v3116_v31 = vld [vmem:[%s4233_s6] sm:$0xff]   ;;  %v3127_v38 = vld [vmem:[%s4234_s7 + $0x18] sm:$0xff]  }
 0x487   : > { %v2265_v14 = vrot.slane %v4055_v10, %v2176_v42  ;;  %v3119_v42 = vld [vmem:[%s4233_s6 + $0x18] sm:$0xff]  }
 0x489   : > { %v2060_v46 = vpop.permute.xlu1 %2059 }
 0x48a   : > { %v2075_v23 = vpop.permute.xlu0 %2074  ;;  %v2225_v32 = vrot.slane %v2060_v46, %v2120_v43  ;;  %v2194_v43 = vadd.s32 4294967184, %v4019_v57 }
 0x48b   : > { %v2250_v37 = vrot.slane %v2075_v23, %v2155_v51  ;;  %v2204_v23 = vsub.s32 %v2201_v54, %v4026_v18 }
 0x48c   : > { %v2197_v13 = vsub.s32 %v2194_v43, %v4026_v18 }
 0x48d   : > { %v2051_v9 = vpop.permute.xlu1 %2050 }
 0x48e   : > { %v2211_v60 = vrot.slane %v2051_v9, %v2101_v30  ;;  %v2078_v20 = vpop.permute.xlu0 %2077 }
 0x48f   : > { %v2255_v8 = vrot.slane %v2078_v20, %v2162_v27 }
 0x490   : > { %v2216_v26 = vsel %vm2108_vm2, %v2215_v22, %v2211_v60  ;;  %vm2569_vm2 = vcmask 523264  }
 0x491   : > { %v2221_v7 = vsel %vm2115_vm3, %v2220_v63, %v2216_v26  ;;  %v2063_v12 = vpop.permute.xlu1 %2062  ;;  %v3117_v26 = vld [vmem:[%s4233_s6 + $0x8] sm:$0xff]   ;;  %vm2613_vm3 = vcmp.ge.s32.totalorder %v4019_v57, 6 }
 0x492   : > { %v2226_v0 = vsel %vm2122_vm4, %v2225_v32, %v2221_v7  ;;  %v2230_v30 = vrot.slane %v2063_v12, %v4047_v53  ;;  %v2093_v4 = vpop.permute.xlu0 %2092  ;;  %v2170_v53 = vrot.slane %v4013_v5, %v2169_v33  ;;  %v3118_v33 = vld [vmem:[%s4233_s6 + $0x10] sm:$0xff]   ;;  %v3120_v7 = vld [vmem:[%s4233_s6 + $0x20] sm:$0xff]   ;;  %v3121_v12 = vld [vmem:[%s4233_s6 + $0x28] sm:$0xff]   ;;  %vm2614_vm4 = vcmp.lt.s32.totalorder %v4019_v57, 9 }
 0x493   : > { %v2280_v59 = vrot.slane %v2093_v4, %v2197_v13  ;;  %v3125_v4 = vld [vmem:[%s4234_s7 + $0x8] sm:$0xff]  }
 0x494   : > { %v2231_v41 = vsel %vm2129_vm5, %v2230_v30, %v2226_v0  ;;  %v2172_v16 = vsel %vm2171_vm11, %v2170_v53, %v2165_v19  ;;  %v3123_v0 = vld [vmem:[%s4233_s6 + $0x38] sm:$0xff]   ;;  %v3124_v30 = vld [vmem:[%s4234_s7] sm:$0xff]   ;;  %vm2615_vm5 = vmand %vm2613_vm3, %vm2614_vm4 }
 0x495   : > { %v2236_v48 = vsel %vm2136_vm6, %v2235_v40, %v2231_v41  ;;  %v2042_v55 = vpop.permute.xlu1 %2041  ;;  %v2179_v29 = vsel %vm2178_vm12, %v2177_v35, %v2172_v16  ;;  %2960 = vmatpush3.bf16.msra.mxu1 %v3124_v30 }
 0x496   : > { %v2241_v36 = vsel %vm2143_vm7, %v2240_v44, %v2236_v48  ;;  %v2087_v11 = vpop.permute.xlu0 %2086  ;;  %v2191_v51 = vrot.slane %v2042_v55, %v2190_v47  ;;  %v2186_v10 = vsel %vm2185_vm13, %v2184_v49, %v2179_v29  ;;  %2961 = vmatprep.subr.bf16.mxu1 %v3217_v61  ;;  %v2445_v55 = vld [vmem:[%s4236_s9 + $0x1] sm:$0x1] }
 0x497   : > { %v2246_v5 = vsel %vm2150_vm8, %v2245_v50, %v2241_v36  ;;  %v2270_v21 = vrot.slane %v2087_v11, %v2183_v1  ;;  %v1952_v1 = vld [vmem:[%s4236_s9] sm:$0x1] }
 0x498   : > { %v2251_v52 = vsel %vm2157_vm9, %v2250_v37, %v2246_v5  ;;  %v2193_v9 = vsel %vm2192_vm14, %v2191_v51, %v2186_v10 }
 0x499   : > { %v2256_v46 = vsel %vm2164_vm10, %v2255_v8, %v2251_v52  ;;  %v2045_v2 = vpop.permute.xlu1 %2044  ;;  %2962 = vmatpush3.bf16.msra.mxu1 %v3125_v4  ;;  %v2544_v8 = vld [vmem:[%s4236_s9 + $0x2] sm:$0x1] }
 0x49a   : > { %v2261_v6 = vsel %vm2171_vm11, %v2260_v17, %v2256_v46  ;;  %v2090_v34 = vpop.permute.xlu0 %2089  ;;  %v2198_v27 = vrot.slane %v2045_v2, %v2197_v13  ;;  %2963 = vmatprep.subr.bf16.mxu1 %v3217_v61 }
 0x49b   : > { %v2266_v25 = vsel %vm2178_vm12, %v2265_v14, %v2261_v6  ;;  %v2275_v56 = vrot.slane %v2090_v34, %v2190_v47 }
 0x49c   : > { %v2271_v45 = vsel %vm2185_vm13, %v2270_v21, %v2266_v25  ;;  %v2200_v20 = vsel %vm2199_vm15, %v2198_v27, %v2193_v9 }
 0x49d   : > { %v2276_v58 = vsel %vm2192_vm14, %v2275_v56, %v2271_v45  ;;  %v2048_v18 = vpop.permute.xlu1 %2047  ;;  %2964 = vmatpush3.bf16.msra.mxu1 %v3126_v28 }
 0x49e   : > { %v2205_v22 = vrot.slane %v2048_v18, %v2204_v23  ;;  %v2096_v60 = vpop.permute.xlu0 %2095  ;;  %v2281_v62 = vsel %vm2199_vm15, %v2280_v59, %v2276_v58  ;;  %2965 = vmatprep.subr.bf16.mxu1 %v3217_v61 }
 0x49f   : > { %v2285_v39 = vrot.slane %v2096_v60, %v2204_v23 }
 0x4a0   : > { %v2207_v24 = vsel %vm2206_vm0, %v2205_v22, %v2200_v20 }
 0x4a1   : > { %v2286_v63 = vsel %vm2206_vm0, %v2285_v39, %v2281_v62  ;;  %v2287_v32 = vpack.c.b16 %v2207_v24, %v2207_v24  ;;  %2966 = vmatpush3.bf16.msra.mxu1 %v3127_v38 }
 0x4a2   : > { %v2288_v3 = vpack.c.b16 %v2286_v63, %v2286_v63 }
 0x4a4   : > { %2419 = vmatprep.mubr.bf16.mxu0 %v2288_v3 }
 0x4a5   : > { %2420 = vmatmul.mubr.bf16.vlgmr.msra.gmra.mrb[16].mxu0 %v2287_v32 }
 0x4a6   : > { %2940 = vmatpush3.bf16.msra.mxu0 %v3116_v31  ;;  %2955 = vmatprep.mubr.msk.bf16.mxu0 %vm3218_vm1, %v3217_v61 }
 0x4a7   : > { %2941 = vmatprep.subr.bf16.mxu0 %v3217_v61 }
 0x4aa   : > { %2942 = vmatpush3.bf16.msra.mxu0 %v3117_v26 }
 0x4ab   : > { %2943 = vmatprep.subr.bf16.mxu0 %v3217_v61 }
 0x4ae   : > { %2944 = vmatpush3.bf16.msra.mxu0 %v3118_v33 }
 0x4af   : > { %2945 = vmatprep.subr.bf16.mxu0 %v3217_v61 }
 0x4b2   : > { %2946 = vmatpush3.bf16.msra.mxu0 %v3119_v42 }
 0x4b3   : > { %2947 = vmatprep.subr.bf16.mxu0 %v3217_v61 }
 0x4b6   : > { %2948 = vmatpush3.bf16.msra.mxu0 %v3120_v7 }
 0x4b7   : > { %2949 = vmatprep.subr.bf16.mxu0 %v3217_v61 }
 0x4ba   : > { %2950 = vmatpush3.bf16.msra.mxu0 %v3121_v12 }
 0x4bb   : > { %2951 = vmatprep.subr.bf16.mxu0 %v3217_v61 }
 0x4be   : > { %2952 = vmatpush3.bf16.msra.mxu0 %v3122_v15 }
 0x4bf   : > { %2953 = vmatprep.subr.bf16.mxu0 %v3217_v61 }
 0x4c2   : > { %2954 = vmatpush3.bf16.msra.mxu0 %v3123_v0 }
 0x578   : > { %v2839_v40 = vpop.f32.mrb[16].mxu0 }
 0x579   : > { %v2840_v44 = vpop.f32.mrb[17].mxu0 }
 0x57a   : > { %v2841_v19 = vadd.f32 %v2840_v44, %v2839_v40  ;;  %v2842_v41 = vpop.f32.mrb[18].mxu0 }
 0x57b   : > { %v2843_v43 = vpop.f32.mrb[19].mxu0 }
 0x57c   : > { %v2422_v53 = vadd.f32 %v2841_v19, %v1952_v1 }
 0x57e   : > { %v2427_v50 = vmax.f32 %v2422_v53, 0.0 }
 0x580   : > { %v2428_v48 = vpack.c.bf16 %v2427_v50, %v2427_v50 }
 0x582   : > { %2956 = vmatmul.mubr.bf16.vlgmr.msra.gmra.mrb[20].mxu0 %v2428_v48 }
 0x655   : > { %v2528_v54 = vpop.f32.mrb[20].mxu0 }
 0x656   : > { %v2529_v61 = vadd.f32 %v2528_v54, %v2445_v55  ;;  %v2957_v37 = vpop.f32.mrb[21].mxu0 }
 0x657   : > { %v2531_v36 = vpop.f32.mrb[22].mxu0 }
 0x658   : > { %v2534_v47 = vmax.f32 %v2529_v61, 0.0  ;;  %v2958_v11 = vpop.f32.mrb[23].mxu0 }
 0x65a   : > { %v2535_v16 = vpack.c.bf16 %v2534_v47, %v2534_v47 }
 0x65c   : > { %2968 = vmatmul.mubr.msk.bf16.vlgmr.msra.gmra.mrb[32].mxu1 %vm2569_vm2, %v2535_v16 }
 0x72f   : > { %v2607_v5 = vpop.f32.mrb[32].mxu1 }
 0x730   : > { %v2608_v35 = vadd.f32 %v2607_v5, %v2544_v8  ;;  %v2969_v17 = vpop.f32.mrb[33].mxu1 }
 0x731   : > { %v2610_v13 = vpop.f32.mrb[34].mxu1 }
 0x732   : > { %v2616_v52 = vmul.f32 1.442695, %v2608_v35  ;;  %v2970_v49 = vpop.f32.mrb[35].mxu1 }
 0x734   : > { %3128 = vpow2.f32 %v2616_v52 }
 0x73e   : > { %v3129_v14 = vpop.eup %3128 }
 0x73f   : > { %v2618_v46 = vsel %vm2615_vm5, %v3129_v14, %v2608_v35 }
 0x740   : > { %2619 = vst [vmem:[%s390_s27] sm:$0x1] %v2618_v46 }
 0x741   : > { %3143 = shalt.err (!%p3140_p5)
}
 0x742   : > { %s3144_s11 = scalar_lea.hbm %s4180_s19, 16  ;;  %s3148_s29 = scalar_lea.hbm %s4237_s10, 32 }
 0x743   : > { %p3145_p6 = scmp.ne.s32.totalorder %s4180_s19, %s3144_s11  ;;  %p3149_p10 = scmp.lt.u32.totalorder %s4180_s19, %s4237_s10 }
 0x744   : > { %p3150_p11 = scmp.lt.u32.totalorder %s3148_s29, %s3144_s11  ;;  %p3152_p13 = scmp.lt.u32.totalorder %s3144_s11, %s4180_s19 }
 0x745   : > { %p3146_p7 = pnand %p3145_p6, %p3315_p4 }
 0x746   : > { %p3151_p12 = por %p3150_p11, %p3149_p10 }
 0x747   : > { %p3147_p9 = pneg %p3146_p7 }
 0x748   : > { %p3153_p0 = por %p3152_p13, %p3151_p12 }
 0x74a   : > { %p3154_p1 = pnand %p3153_p0, %p3147_p9 }
 0x74c   : > { %3157 = shalt.err (!%p3154_p1)
}
 0x74d   : > { %2971 = dma.vmem_to_hbm [thread:$0]  (%p3315_p4), %s4182_s28, 16, %s4180_s19, %s2621_s20  }
 0x74e PF: > { %p2977_p2 = scmp.ge.s32.totalorder %s3208_s18, 2  ;;  %s2645_s0 = sand.u32 1, %s3188_s13  }
 0x74f   : > { %s2646_s22 = scalar_lea.sflag [#allocation4], %s2645_s0 }
 0x750   : > { %p2974_p3 = pnand %p2977_p2, %p3322_p8 }
 0x752   : > { %3183 = dma.done.wait (!%p2974_p3), %s2646_s22, 16  }
 0x753   : > { %3185 = vsyncadd (!%p2974_p3), %s2646_s22, 4294967280  ;;  %s23_s18 = sadd.s32 1, %s3208_s18   ;;  %s4242_s13 = smov %s3192_s14 }
 0x754   : > { %p20_p5 = scmp.ge.s32.totalorder %s23_s18, 4   ;;  %s4243_s14 = smov %s3196_s15 }
 0x755   : > { %s4244_s15 = smov %s3328_s26  ;;  %s4245_s16 = smov %s3204_s17 }
 0x756   : > { %s4246_s17 = smov %s4248_s21  ;;  %22 = sbr.rel (!%p20_p5) target bundleno = 6 (0x6), region = 106 }
 0x75d   :  { %2650 = vsyncpa [#allocation4], 1 }
 0x75e   :  { %2652 = vsyncpa [#allocation4 + $0x1], 1 }

</bundles_post_ra>
